<compile_context>
chip_gen: v6e
topology: v6e:2x2x1
jax: 0.10.0
libtpu: 0.0.40
codegen_flags: <defaults>
</compile_context>

<pallas_src>
from math import ceil

import jax
import jax.numpy as jnp
from jax import lax
from jax.experimental import pallas as pl
from jax.experimental.pallas import tpu as pltpu

EPS = 1e-15
AVERAGE_NODES = 40


# ----------------------------------------------------------------------------- VMEM budgeting

def _vmem_budget():
    cap = 64 << 20  # conservative default (v7x has 64 MiB per TC)
    try:
        info = pltpu.get_tpu_info()
        cap = int(getattr(info, "vmem_capacity_bytes", cap))
    except Exception:
        pass
    # leave >=16 MiB headroom; never ask for more than 96 MiB of scoped VMEM
    return max(min(cap - (16 << 20), 96 << 20), 16 << 20)


def _pick_gcn_tile(n, h, budget):
    for t in (2048, 1024, 512, 256, 128):
        if n % t == 0:
            need = 2 * (t * t * 2 + t * h * 2 + h * 4 + t * h * 2) + t * h * 4 + (2 << 20)
            if need <= budget:
                return t
    return n  # full extent (always legal w.r.t. the (8,128) block constraint)


def _pick_group(b):
    # largest group size that divides B while keeping >=2 grid steps (2 TCs on v7x)
    for gb in (8, 4, 2):
        if b % gb == 0 and b // gb >= 2:
            return gb
    return 1


# ----------------------------------------------------------------------------- kernels

def gcn_kernel(a_ref, xw_ref, b_ref, o_ref, acc_ref):
    # out = relu(A_hat @ XW + b), tiled over (row tiles, contraction tiles).
    @pl.when(pl.program_id(1) == 0)
    def _():
        acc_ref[...] = jnp.zeros_like(acc_ref)

    acc_ref[...] += lax.dot_general(
        a_ref[...], xw_ref[...],
        dimension_numbers=(((1,), (0,)), ((), ())),
        preferred_element_type=jnp.float32)

    @pl.when(pl.program_id(1) == pl.num_programs(1) - 1)
    def _():
        o_ref[...] = jnp.maximum(acc_ref[...] + b_ref[...], 0.0).astype(o_ref.dtype)


def fused_dense_kernel(xd_ref, adj_ref, mask_ref,
                       p1w_ref, p1b_ref,
                       c2wrel_ref, c2brel_ref, c2wroot_ref,
                       p2w_ref, p2b_ref,
                       c3wrel_ref, c3brel_ref, c3wroot_ref,
                       l1w_ref, l1b_ref, l2w_ref, l2b_ref,
                       out_ref):
    f32 = jnp.float32
    bf16 = jnp.bfloat16

    GB = xd_ref.shape[0]
    K1 = p1w_ref.shape[1]
    K2 = p2w_ref.shape[1]
    PACK = l2w_ref.shape[1]          # lin2 is pre-padded to PACK lanes

    def dot(a, b, contract=((1,), (0,))):
        # bf16 MXU operands with f32 accumulation; elementwise math stays f32.
        return lax.dot_general(a.astype(bf16), b.astype(bf16),
                               dimension_numbers=(contract, ((), ())),
                               preferred_element_type=f32)

    def softmax_last(z):
        z = z - jnp.max(z, axis=-1, keepdims=True)
        e = jnp.exp(z)
        return e * pl.reciprocal(jnp.sum(e, axis=-1, keepdims=True), approx=True)

    def eye(k):
        r = lax.broadcasted_iota(jnp.int32, (k, k), 0)
        c = lax.broadcasted_iota(jnp.int32, (k, k), 1)
        return (r == c).astype(f32)

    eye1 = eye(K1)
    eye2 = eye(K2)

    # hoist weight loads out of the per-graph loop
    p1w = p1w_ref[...]; p1b = p1b_ref[...]
    c2wrel = c2wrel_ref[...]; c2brel = c2brel_ref[...]; c2wroot = c2wroot_ref[...]
    p2w = p2w_ref[...]; p2b = p2b_ref[...]
    c3wrel = c3wrel_ref[...]; c3brel = c3brel_ref[...]; c3wroot = c3wroot_ref[...]
    l1w = l1w_ref[...]; l1b = l1b_ref[...]
    l2w = l2w_ref[...]; l2b = l2b_ref[...]

    def mincut(x, adj, s_logits, mask, eye_k, k):
        s = softmax_last(s_logits)                           # [N, K] f32
        if mask is not None:
            x = x * mask
            s = s * mask

        # S^T X, A S, S^T A S  -- node axis contracted directly (no transpose)
        x_pool = dot(s, x, contract=((0,), (0,)))            # [K, F]
        adj_s = dot(adj, s)                                  # [N, K]
        out_adj = dot(s, adj_s, contract=((0,), (0,)))       # [K, K]

        # mincut loss
        mincut_num = jnp.sum(adj_s * s)                      # trace(S^T A S)
        d_flat = jnp.sum(adj.astype(f32), axis=-1, keepdims=True)   # [N, 1]
        mincut_den = jnp.sum(d_flat * s * s)                 # trace(S^T D S)
        mc_loss = -(mincut_num / (mincut_den + EPS))

        # orthogonality loss
        ss = dot(s, s, contract=((0,), (0,)))                # [K, K]
        ss_fro = jnp.sqrt(jnp.sum(ss * ss)) + EPS
        diff = ss / ss_fro - eye_k * (1.0 / (k ** 0.5))
        ortho = jnp.sqrt(jnp.sum(diff * diff))

        # zero diagonal + symmetric normalization (out_adj is symmetric, so the
        # column normalizer is a second keepdims sum -- no transpose needed)
        oa = out_adj * (1.0 - eye_k)
        deg_r = jnp.sum(oa, axis=-1, keepdims=True)          # [K, 1]
        deg_c = jnp.sum(oa, axis=-2, keepdims=True)          # [1, K]
        inv_r = jnp.where(deg_r > 0.0,
                          pl.reciprocal(jnp.sqrt(deg_r) + EPS, approx=True), 0.0)
        inv_c = jnp.where(deg_c > 0.0,
                          pl.reciprocal(jnp.sqrt(deg_c) + EPS, approx=True), 0.0)
        oa = oa * inv_r * inv_c
        return x_pool, oa, mc_loss, ortho

    lane = lax.broadcasted_iota(jnp.int32, (1, PACK), 1)

    rows = []
    for g in range(GB):                                      # static unroll: GB chains
        x = xd_ref[g]                                        # [N, H] bf16
        adj = adj_ref[g]                                     # [N, N] bf16
        m = mask_ref[g]                                      # [N, 1] bf16

        # pool1 projection + dense_mincut_pool #1 (masked)
        s1 = dot(x, p1w) + p1b                               # [N, K1]
        x1, adj1, mc1, o1 = mincut(x, adj, s1, m, eye1, K1)

        # conv2: relu(DenseGraphConv(x1, adj1))  (aggr='add', root has no bias)
        agg1 = dot(adj1, x1)                                 # [K1, H]
        h2 = jnp.maximum(dot(agg1, c2wrel) + c2brel + dot(x1, c2wroot), 0.0)

        # pool2 projection + dense_mincut_pool #2 (no mask)
        s2 = dot(h2, p2w) + p2b                              # [K1, K2]
        x2, adj2, mc2, o2 = mincut(h2, adj1, s2, None, eye2, K2)

        # conv3: DenseGraphConv (no relu)
        agg2 = dot(adj2, x2)                                 # [K2, H]
        h3 = dot(agg2, c3wrel) + c3brel + dot(x2, c3wroot)

        # readout: mean over clusters -> relu(lin1) -> lin2 (lin2 pre-padded)
        xm = jnp.mean(h3, axis=0, keepdims=True)             # [1, H]
        r = jnp.maximum(dot(xm, l1w) + l1b, 0.0)
        logits = dot(r, l2w) + l2b                           # [1, PACK], lanes >= Cout are 0

        # pack per-graph losses into the last 4 lanes: [mc1, o1, mc2, o2]
        packed = (logits
                  + jnp.where(lane == PACK - 4, mc1, 0.0)
                  + jnp.where(lane == PACK - 3, o1, 0.0)
                  + jnp.where(lane == PACK - 2, mc2, 0.0)
                  + jnp.where(lane == PACK - 1, o2, 0.0))
        rows.append(packed)

    row = rows[0] if GB == 1 else jnp.concatenate(rows, axis=1)   # [1, GB*PACK]
    out_ref[0] = row


# ----------------------------------------------------------------------------- wrappers

def run_gcn(a_hat_bf16, xw_bf16, b):
    n = a_hat_bf16.shape[0]
    h = xw_bf16.shape[1]
    budget = _vmem_budget()
    t = _pick_gcn_tile(n, h, budget)
    tm = tk = t

    need = 2 * (tm * tk * 2 + tk * h * 2 + h * 4 + tm * h * 2) + tm * h * 4 + (2 << 20)
    vmem = int(min(max(need, 16 << 20), budget))

    return pl.pallas_call(
        gcn_kernel,
        out_shape=jax.ShapeDtypeStruct((n, h), jnp.bfloat16),
        grid=(n // tm, n // tk),
        in_specs=[pl.BlockSpec((tm, tk), lambda i, k: (i, k)),
                  pl.BlockSpec((tk, h), lambda i, k: (k, 0)),
                  pl.BlockSpec((1, h), lambda i, k: (0, 0))],
        out_specs=pl.BlockSpec((tm, h), lambda i, k: (i, 0)),
        scratch_shapes=[pltpu.VMEM((tm, h), jnp.float32)],
        compiler_params=pltpu.CompilerParams(
            dimension_semantics=("parallel", "arbitrary"),
            vmem_limit_bytes=vmem),
    )(a_hat_bf16, xw_bf16, b)


def run_fused_dense_stage(params, xd, adj, maskf):
    B, N, H = xd.shape
    K1 = params["pool1_w"].shape[1]
    K2 = params["pool2_w"].shape[1]
    Cout = params["lin2_w"].shape[1]
    PACK = ((Cout + 4 + 7) // 8) * 8         # logits + 4 loss lanes, padded
    GB = _pick_group(B)
    steps = B // GB

    bf16 = jnp.bfloat16
    f32 = jnp.float32

    # zero-pad lin2 so the final dot directly yields a PACK-lane row
    l2w_pad = jnp.zeros((H, PACK), f32).at[:, :Cout].set(params["lin2_w"]).astype(bf16)
    l2b_pad = jnp.zeros((1, PACK), f32).at[:, :Cout].set(params["lin2_b"].reshape(1, -1))

    wcast = lambda name: params[name].astype(bf16)
    bvec = lambda name: params[name].reshape(1, -1)   # biases stay f32 (added to f32 accum)

    per_b = lambda s: (s, 0, 0)
    const2 = lambda s: (0, 0)

    in_specs = [
        pl.BlockSpec((GB, N, H), per_b),       # xd
        pl.BlockSpec((GB, N, N), per_b),       # adj
        pl.BlockSpec((GB, N, 1), per_b),       # mask
        pl.BlockSpec((H, K1), const2),         # pool1_w
        pl.BlockSpec((1, K1), const2),         # pool1_b
        pl.BlockSpec((H, H), const2),          # conv2_wrel
        pl.BlockSpec((1, H), const2),          # conv2_brel
        pl.BlockSpec((H, H), const2),          # conv2_wroot
        pl.BlockSpec((H, K2), const2),         # pool2_w
        pl.BlockSpec((1, K2), const2),         # pool2_b
        pl.BlockSpec((H, H), const2),          # conv3_wrel
        pl.BlockSpec((1, H), const2),          # conv3_brel
        pl.BlockSpec((H, H), const2),          # conv3_wroot
        pl.BlockSpec((H, H), const2),          # lin1_w
        pl.BlockSpec((1, H), const2),          # lin1_b
        pl.BlockSpec((H, PACK), const2),       # lin2_w (padded)
        pl.BlockSpec((1, PACK), const2),       # lin2_b (padded)
    ]
    out_specs = pl.BlockSpec((1, 1, GB * PACK), lambda s: (s, 0, 0))
    out_shape = jax.ShapeDtypeStruct((steps, 1, GB * PACK), jnp.float32)

    budget = _vmem_budget()
    step_in = 2 * GB * (N * H + N * N + N) * 2
    weights = 2 * ((H * K1 + 5 * H * H + H * K2 + H * PACK) * 2
                   + (K1 + K2 + 3 * H + PACK) * 4)
    out_b = 2 * GB * PACK * 4
    vmem = int(min(max(step_in + weights + out_b + (4 << 20), 16 << 20), budget))

    packed = pl.pallas_call(
        fused_dense_kernel,
        out_shape=out_shape,
        grid=(steps,),
        in_specs=in_specs,
        out_specs=out_specs,
        compiler_params=pltpu.CompilerParams(
            dimension_semantics=("parallel",),
            vmem_limit_bytes=vmem),
    )(xd.astype(bf16), adj.astype(bf16), maskf.astype(bf16),
      wcast("pool1_w"), bvec("pool1_b"),
      wcast("conv2_wrel"), bvec("conv2_brel"), wcast("conv2_wroot"),
      wcast("pool2_w"), bvec("pool2_b"),
      wcast("conv3_wrel"), bvec("conv3_brel"), wcast("conv3_wroot"),
      wcast("lin1_w"), bvec("lin1_b"),
      l2w_pad, l2b_pad)

    packed = packed.reshape(B, PACK)
    out = packed[:, :Cout]                    # [B, Cout]
    losses = packed[:, PACK - 4:]             # [B, 4] = [mc1, o1, mc2, o2]
    return out, losses


# ----------------------------------------------------------------------------- glue (index plumbing)

def gcn_norm_dense(edge_index, num_nodes):
    # A_hat = D^{-1/2} (A + I) D^{-1/2} for the block-diagonal batch graph.
    # Emitted directly in bf16 (cast fused into the normalization multiply).
    row, col = edge_index[0], edge_index[1]
    a = jnp.zeros((num_nodes, num_nodes), jnp.float32).at[col, row].add(1.0)
    a = a + jnp.eye(num_nodes, dtype=jnp.float32)
    deg = jnp.sum(a, axis=1)
    dinv = 1.0 / jnp.sqrt(deg)
    return (a * dinv[:, None] * dinv[None, :]).astype(jnp.bfloat16)


def to_dense_batch(x, batch, num_graphs, max_nodes):
    n = x.shape[0]
    one_hot = (batch[:, None] == jnp.arange(num_graphs)[None, :]).astype(jnp.int32)
    pos = jnp.cumsum(one_hot, axis=0)[jnp.arange(n), batch] - 1
    dense = jnp.zeros((num_graphs, max_nodes, x.shape[-1]), x.dtype).at[batch, pos].set(x)
    mask = jnp.zeros((num_graphs, max_nodes), jnp.float32).at[batch, pos].set(1.0)
    return dense, mask, pos


def to_dense_adj(edge_index, batch, pos, num_graphs, max_nodes):
    row, col = edge_index[0], edge_index[1]
    b = batch[row]
    adj = jnp.zeros((num_graphs, max_nodes, max_nodes), jnp.float32)
    return adj.at[b, pos[row], pos[col]].add(1.0)


# ----------------------------------------------------------------------------- model

def init_params(key, in_channels, out_channels, hidden=32):
    k1_nodes = ceil(0.5 * AVERAGE_NODES)   # 20
    k2_nodes = ceil(0.5 * k1_nodes)        # 10
    keys = jax.random.split(key, 16)

    def w(k, fan_in, fan_out):
        return (jax.random.normal(k, (fan_in, fan_out), jnp.float32)
                / jnp.sqrt(jnp.float32(fan_in)))

    p = {
        "conv1_w": w(keys[0], in_channels, hidden),
        "conv1_b": 0.01 * jax.random.normal(keys[1], (hidden,), jnp.float32),
        "pool1_w": w(keys[2], hidden, k1_nodes),
        "pool1_b": 0.01 * jax.random.normal(keys[3], (k1_nodes,), jnp.float32),
        "conv2_wrel": w(keys[4], hidden, hidden),
        "conv2_brel": 0.01 * jax.random.normal(keys[5], (hidden,), jnp.float32),
        "conv2_wroot": w(keys[6], hidden, hidden),
        "pool2_w": w(keys[7], hidden, k2_nodes),
        "pool2_b": 0.01 * jax.random.normal(keys[8], (k2_nodes,), jnp.float32),
        "conv3_wrel": w(keys[9], hidden, hidden),
        "conv3_brel": 0.01 * jax.random.normal(keys[10], (hidden,), jnp.float32),
        "conv3_wroot": w(keys[11], hidden, hidden),
        "lin1_w": w(keys[12], hidden, hidden),
        "lin1_b": 0.01 * jax.random.normal(keys[13], (hidden,), jnp.float32),
        "lin2_w": w(keys[14], hidden, out_channels),
        "lin2_b": 0.01 * jax.random.normal(keys[15], (out_channels,), jnp.float32),
    }
    return p, k1_nodes, k2_nodes


def mincut_pool_forward(params, x, edge_index, batch, num_graphs, max_nodes):
    ntot = x.shape[0]

    # conv1 (GCNConv) + relu: X@W hoisted to XLA, A_hat@XW as a tiled Pallas matmul
    a_hat = gcn_norm_dense(edge_index, ntot)                             # bf16 [Ntot,Ntot]
    xw = jnp.dot(x, params["conv1_w"]).astype(jnp.bfloat16)              # bf16 [Ntot,H]
    h = run_gcn(a_hat, xw, params["conv1_b"].reshape(1, -1))             # bf16 [Ntot,H]

    # densify (index plumbing stays in plain JAX)
    xd, mask, pos = to_dense_batch(h, batch, num_graphs, max_nodes)      # [B,N,H], [B,N]
    adj = to_dense_adj(edge_index, batch, pos, num_graphs, max_nodes)    # [B,N,N]
    maskf = mask.reshape(num_graphs, max_nodes, 1)

    # fused: pool1 -> mincut1 -> conv2 -> pool2 -> mincut2 -> conv3 -> readout
    out, losses = run_fused_dense_stage(params, xd, adj, maskf)
    aux = (jnp.mean(losses[:, 0]) + jnp.mean(losses[:, 1])
           + jnp.mean(losses[:, 2]) + jnp.mean(losses[:, 3]))
    return out, aux


# ----------------------------------------------------------------------------- main

if __name__ == "__main__":
    key = jax.random.PRNGKey(0)
    in_channels, hidden, out_channels = 4, 32, 6
    B, N = 2, 8                      # 2 graphs of 8 nodes each
    ntot = B * N

    pkey, xkey = jax.random.split(key)
    params, k1_nodes, k2_nodes = init_params(pkey, in_channels, out_channels, hidden)

    # node features
    x = jax.random.normal(xkey, (ntot, in_channels), jnp.float32)

    # undirected ring graph per batch element (both edge directions)
    rows, cols = [], []
    for g in range(B):
        off = g * N
        for i in range(N):
            j = (i + 1) % N
            rows += [off + i, off + j]
            cols += [off + j, off + i]
    edge_index = jnp.array([rows, cols], dtype=jnp.int32)               # [2, E]
    batch = jnp.repeat(jnp.arange(B, dtype=jnp.int32), N)               # [Ntot]

    fwd = jax.jit(mincut_pool_forward, static_argnums=(4, 5))
    out, aux_loss = fwd(params, x, edge_index, batch, B, N)
    out = jax.block_until_ready(out)
    aux_loss = jax.block_until_ready(aux_loss)

    assert out.shape == (B, out_channels)
    assert bool(jnp.isfinite(out).all()) and bool(jnp.isfinite(aux_loss))
    print("KERNEL_OK")
</pallas_src>

<mosaic_0001>
module attributes {stable_mosaic.version = 11 : i64} {
  func.func private @main(%arg0: i32) attributes {dimension_semantics = [#tpu.dimension_semantics<core_parallel>], iteration_bounds = array<i64: 2>, tpu.core_type = #tpu.core_type<sc_scalar_subcore>, window_params = []} {
    return
  }
}

module attributes {stable_mosaic.version = 11 : i64} {
  func.func private @main(%arg0: i32) attributes {dimension_semantics = [#tpu.dimension_semantics<core_parallel>], iteration_bounds = array<i64: 2>, tpu.core_type = #tpu.core_type<sc_scalar_subcore>, window_params = []} {
    return
  }
}

module attributes {stable_mosaic.version = 11 : i64} {
  func.func @gcn_kernel(%arg0: i32, %arg1: i32, %arg2: memref<16x16xbf16, #tpu.memory_space<vmem>>, %arg3: memref<16x32xbf16, #tpu.memory_space<vmem>>, %arg4: memref<1x32xf32, #tpu.memory_space<vmem>>, %arg5: memref<16x32xbf16, #tpu.memory_space<vmem>>, %arg6: memref<16x32xf32, #tpu.memory_space<vmem>>) attributes {dimension_semantics = [#tpu.dimension_semantics<parallel>, #tpu.dimension_semantics<arbitrary>], iteration_bounds = array<i64: 1, 1>, scalar_prefetch = 0 : i64, scratch_operands = 1 : i64, tpu.core_type = #tpu.core_type<tc>, window_params = [{transform_indices = @transform_0, window_bounds = array<i64: 16, 16>}, {transform_indices = @transform_1, window_bounds = array<i64: 16, 32>}, {pipeline_mode = #tpu.pipeline_mode<synchronous>, transform_indices = @transform_2, window_bounds = array<i64: 1, 32>}, {transform_indices = @transform_3, window_bounds = array<i64: 16, 32>}]} {
    %c0_i32 = arith.constant 0 : i32
    %0 = arith.cmpi eq, %arg1, %c0_i32 : i32
    %1 = arith.extui %0 : i1 to i32
    %c0_i32_0 = arith.constant 0 : i32
    %2 = arith.cmpi ne, %1, %c0_i32_0 : i32
    scf.if %2 {
      %cst_10 = arith.constant 0.000000e+00 : f32
      %12 = vector.broadcast %cst_10 : f32 to vector<16x32xf32>
      %c0_11 = arith.constant 0 : index
      %c0_12 = arith.constant 0 : index
      %13 = vector.load %arg6[%c0_11, %c0_12] : memref<16x32xf32, #tpu.memory_space<vmem>>, vector<16x32xf32>
      tpu.vector_store %arg6[%c0_11, %c0_12], %12 {strides = array<i32>} : memref<16x32xf32, #tpu.memory_space<vmem>>, vector<16x32xf32>,
    } else {
    }
    %c0 = arith.constant 0 : index
    %c0_1 = arith.constant 0 : index
    %3 = vector.load %arg6[%c0, %c0_1] : memref<16x32xf32, #tpu.memory_space<vmem>>, vector<16x32xf32>
    %c0_2 = arith.constant 0 : index
    %c0_3 = arith.constant 0 : index
    %4 = vector.load %arg2[%c0_2, %c0_3] : memref<16x16xbf16, #tpu.memory_space<vmem>>, vector<16x16xbf16>
    %c0_4 = arith.constant 0 : index
    %c0_5 = arith.constant 0 : index
    %5 = vector.load %arg3[%c0_4, %c0_5] : memref<16x32xbf16, #tpu.memory_space<vmem>>, vector<16x32xbf16>
    %cst = arith.constant dense<0.000000e+00> : vector<16x32xf32>
    %6 = tpu.matmul %4, %5, %cst {dimension_numbers = #tpu.dot_dimension_numbers<[1], [0], [0], [1], [0, 0, 1, 1], [], []>} : vector<16x16xbf16>, vector<16x32xbf16>, vector<16x32xf32> -> vector<16x32xf32>
    %7 = arith.addf %3, %6 : vector<16x32xf32>
    %c0_6 = arith.constant 0 : index
    %c0_7 = arith.constant 0 : index
    %8 = vector.load %arg6[%c0_6, %c0_7] : memref<16x32xf32, #tpu.memory_space<vmem>>, vector<16x32xf32>
    tpu.vector_store %arg6[%c0_6, %c0_7], %7 {strides = array<i32>} : memref<16x32xf32, #tpu.memory_space<vmem>>, vector<16x32xf32>,
    %c0_i32_8 = arith.constant 0 : i32
    %9 = arith.cmpi eq, %arg1, %c0_i32_8 : i32
    %10 = arith.extui %9 : i1 to i32
    %c0_i32_9 = arith.constant 0 : i32
    %11 = arith.cmpi ne, %10, %c0_i32_9 : i32
    scf.if %11 {
      %c0_10 = arith.constant 0 : index
      %c0_11 = arith.constant 0 : index
      %12 = vector.load %arg6[%c0_10, %c0_11] : memref<16x32xf32, #tpu.memory_space<vmem>>, vector<16x32xf32>
      %c0_12 = arith.constant 0 : index
      %c0_13 = arith.constant 0 : index
      %13 = vector.load %arg4[%c0_12, %c0_13] : memref<1x32xf32, #tpu.memory_space<vmem>>, vector<1x32xf32>
      %14 = vector.broadcast %13 : vector<1x32xf32> to vector<16x32xf32>
      %15 = arith.addf %12, %14 : vector<16x32xf32>
      %cst_14 = arith.constant 0.000000e+00 : f32
      %16 = vector.broadcast %cst_14 : f32 to vector<16x32xf32>
      %17 = arith.maximumf %15, %16 : vector<16x32xf32>
      %18 = arith.truncf %17 : vector<16x32xf32> to vector<16x32xbf16>
      %c0_15 = arith.constant 0 : index
      %c0_16 = arith.constant 0 : index
      %19 = vector.load %arg5[%c0_15, %c0_16] : memref<16x32xbf16, #tpu.memory_space<vmem>>, vector<16x32xbf16>
      tpu.vector_store %arg5[%c0_15, %c0_16], %18 {strides = array<i32>} : memref<16x32xbf16, #tpu.memory_space<vmem>>, vector<16x32xbf16>,
    } else {
    }
    return
  }
  func.func @transform_0(%arg0: i32, %arg1: i32) -> (i32, i32) {
    %c0_i32 = arith.constant 0 : i32
    return %arg0, %arg1 : i32, i32
  }
  func.func @transform_1(%arg0: i32, %arg1: i32) -> (i32, i32) {
    %c0_i32 = arith.constant 0 : i32
    %c0_i32_0 = arith.constant 0 : i32
    return %arg1, %c0_i32 : i32, i32
  }
  func.func @transform_2(%arg0: i32, %arg1: i32) -> (i32, i32) {
    %c0_i32 = arith.constant 0 : i32
    %c0_i32_0 = arith.constant 0 : i32
    %c0_i32_1 = arith.constant 0 : i32
    return %c0_i32, %c0_i32_0 : i32, i32
  }
  func.func @transform_3(%arg0: i32, %arg1: i32) -> (i32, i32) {
    %c0_i32 = arith.constant 0 : i32
    %c0_i32_0 = arith.constant 0 : i32
    return %arg0, %c0_i32 : i32, i32
  }
}

module attributes {stable_mosaic.version = 11 : i64} {
  func.func @fused_dense_kernel(%arg0: i32, %arg1: memref<1x8x32xbf16, #tpu.memory_space<vmem>>, %arg2: memref<1x8x8xbf16, #tpu.memory_space<vmem>>, %arg3: memref<1x8x1xbf16, #tpu.memory_space<vmem>>, %arg4: memref<32x20xbf16, #tpu.memory_space<vmem>>, %arg5: memref<1x20xf32, #tpu.memory_space<vmem>>, %arg6: memref<32x32xbf16, #tpu.memory_space<vmem>>, %arg7: memref<1x32xf32, #tpu.memory_space<vmem>>, %arg8: memref<32x32xbf16, #tpu.memory_space<vmem>>, %arg9: memref<32x10xbf16, #tpu.memory_space<vmem>>, %arg10: memref<1x10xf32, #tpu.memory_space<vmem>>, %arg11: memref<32x32xbf16, #tpu.memory_space<vmem>>, %arg12: memref<1x32xf32, #tpu.memory_space<vmem>>, %arg13: memref<32x32xbf16, #tpu.memory_space<vmem>>, %arg14: memref<32x32xbf16, #tpu.memory_space<vmem>>, %arg15: memref<1x32xf32, #tpu.memory_space<vmem>>, %arg16: memref<32x16xbf16, #tpu.memory_space<vmem>>, %arg17: memref<1x16xf32, #tpu.memory_space<vmem>>, %arg18: memref<1x1x16xf32, #tpu.memory_space<vmem>>) attributes {dimension_semantics = [#tpu.dimension_semantics<parallel>], iteration_bounds = array<i64: 2>, scalar_prefetch = 0 : i64, scratch_operands = 0 : i64, tpu.core_type = #tpu.core_type<tc>, window_params = [{transform_indices = @transform_0, window_bounds = array<i64: 1, 8, 32>}, {transform_indices = @transform_1, window_bounds = array<i64: 1, 8, 8>}, {transform_indices = @transform_2, window_bounds = array<i64: 1, 8, 1>}, {pipeline_mode = #tpu.pipeline_mode<synchronous>, transform_indices = @transform_3, window_bounds = array<i64: 32, 20>}, {pipeline_mode = #tpu.pipeline_mode<synchronous>, transform_indices = @transform_4, window_bounds = array<i64: 1, 20>}, {pipeline_mode = #tpu.pipeline_mode<synchronous>, transform_indices = @transform_5, window_bounds = array<i64: 32, 32>}, {pipeline_mode = #tpu.pipeline_mode<synchronous>, transform_indices = @transform_6, window_bounds = array<i64: 1, 32>}, {pipeline_mode = #tpu.pipeline_mode<synchronous>, transform_indices = @transform_7, window_bounds = array<i64: 32, 32>}, {pipeline_mode = #tpu.pipeline_mode<synchronous>, transform_indices = @transform_8, window_bounds = array<i64: 32, 10>}, {pipeline_mode = #tpu.pipeline_mode<synchronous>, transform_indices = @transform_9, window_bounds = array<i64: 1, 10>}, {pipeline_mode = #tpu.pipeline_mode<synchronous>, transform_indices = @transform_10, window_bounds = array<i64: 32, 32>}, {pipeline_mode = #tpu.pipeline_mode<synchronous>, transform_indices = @transform_11, window_bounds = array<i64: 1, 32>}, {pipeline_mode = #tpu.pipeline_mode<synchronous>, transform_indices = @transform_12, window_bounds = array<i64: 32, 32>}, {pipeline_mode = #tpu.pipeline_mode<synchronous>, transform_indices = @transform_13, window_bounds = array<i64: 32, 32>}, {pipeline_mode = #tpu.pipeline_mode<synchronous>, transform_indices = @transform_14, window_bounds = array<i64: 1, 32>}, {pipeline_mode = #tpu.pipeline_mode<synchronous>, transform_indices = @transform_15, window_bounds = array<i64: 32, 16>}, {pipeline_mode = #tpu.pipeline_mode<synchronous>, transform_indices = @transform_16, window_bounds = array<i64: 1, 16>}, {transform_indices = @transform_17, window_bounds = array<i64: 1, 1, 16>}]} {
    %0 = tpu.iota {dimensions = array<i32: 0>} : vector<20x20xi32>
    %1 = tpu.iota {dimensions = array<i32: 1>} : vector<20x20xi32>
    %2 = arith.cmpi eq, %0, %1 : vector<20x20xi32>
    %3 = arith.extui %2 : vector<20x20xi1> to vector<20x20xi32>
    %4 = arith.sitofp %3 : vector<20x20xi32> to vector<20x20xf32>
    %5 = tpu.iota {dimensions = array<i32: 0>} : vector<10x10xi32>
    %6 = tpu.iota {dimensions = array<i32: 1>} : vector<10x10xi32>
    %7 = arith.cmpi eq, %5, %6 : vector<10x10xi32>
    %8 = arith.extui %7 : vector<10x10xi1> to vector<10x10xi32>
    %9 = arith.sitofp %8 : vector<10x10xi32> to vector<10x10xf32>
    %c0 = arith.constant 0 : index
    %c0_0 = arith.constant 0 : index
    %10 = vector.load %arg4[%c0, %c0_0] : memref<32x20xbf16, #tpu.memory_space<vmem>>, vector<32x20xbf16>
    %c0_1 = arith.constant 0 : index
    %c0_2 = arith.constant 0 : index
    %11 = vector.load %arg5[%c0_1, %c0_2] : memref<1x20xf32, #tpu.memory_space<vmem>>, vector<1x20xf32>
    %c0_3 = arith.constant 0 : index
    %c0_4 = arith.constant 0 : index
    %12 = vector.load %arg6[%c0_3, %c0_4] : memref<32x32xbf16, #tpu.memory_space<vmem>>, vector<32x32xbf16>
    %c0_5 = arith.constant 0 : index
    %c0_6 = arith.constant 0 : index
    %13 = vector.load %arg7[%c0_5, %c0_6] : memref<1x32xf32, #tpu.memory_space<vmem>>, vector<1x32xf32>
    %c0_7 = arith.constant 0 : index
    %c0_8 = arith.constant 0 : index
    %14 = vector.load %arg8[%c0_7, %c0_8] : memref<32x32xbf16, #tpu.memory_space<vmem>>, vector<32x32xbf16>
    %c0_9 = arith.constant 0 : index
    %c0_10 = arith.constant 0 : index
    %15 = vector.load %arg9[%c0_9, %c0_10] : memref<32x10xbf16, #tpu.memory_space<vmem>>, vector<32x10xbf16>
    %c0_11 = arith.constant 0 : index
    %c0_12 = arith.constant 0 : index
    %16 = vector.load %arg10[%c0_11, %c0_12] : memref<1x10xf32, #tpu.memory_space<vmem>>, vector<1x10xf32>
    %c0_13 = arith.constant 0 : index
    %c0_14 = arith.constant 0 : index
    %17 = vector.load %arg11[%c0_13, %c0_14] : memref<32x32xbf16, #tpu.memory_space<vmem>>, vector<32x32xbf16>
    %c0_15 = arith.constant 0 : index
    %c0_16 = arith.constant 0 : index
    %18 = vector.load %arg12[%c0_15, %c0_16] : memref<1x32xf32, #tpu.memory_space<vmem>>, vector<1x32xf32>
    %c0_17 = arith.constant 0 : index
    %c0_18 = arith.constant 0 : index
    %19 = vector.load %arg13[%c0_17, %c0_18] : memref<32x32xbf16, #tpu.memory_space<vmem>>, vector<32x32xbf16>
    %c0_19 = arith.constant 0 : index
    %c0_20 = arith.constant 0 : index
    %20 = vector.load %arg14[%c0_19, %c0_20] : memref<32x32xbf16, #tpu.memory_space<vmem>>, vector<32x32xbf16>
    %c0_21 = arith.constant 0 : index
    %c0_22 = arith.constant 0 : index
    %21 = vector.load %arg15[%c0_21, %c0_22] : memref<1x32xf32, #tpu.memory_space<vmem>>, vector<1x32xf32>
    %c0_23 = arith.constant 0 : index
    %c0_24 = arith.constant 0 : index
    %22 = vector.load %arg16[%c0_23, %c0_24] : memref<32x16xbf16, #tpu.memory_space<vmem>>, vector<32x16xbf16>
    %c0_25 = arith.constant 0 : index
    %c0_26 = arith.constant 0 : index
    %23 = vector.load %arg17[%c0_25, %c0_26] : memref<1x16xf32, #tpu.memory_space<vmem>>, vector<1x16xf32>
    %24 = tpu.iota {dimensions = array<i32: 1>} : vector<1x16xi32>
    %c0_27 = arith.constant 0 : index
    %c0_28 = arith.constant 0 : index
    %c0_29 = arith.constant 0 : index
    %25 = vector.load %arg1[%c0_27, %c0_28, %c0_29] : memref<1x8x32xbf16, #tpu.memory_space<vmem>>, vector<1x8x32xbf16>
    %26 = vector.shape_cast %25 : vector<1x8x32xbf16> to vector<8x32xbf16>
    %c0_30 = arith.constant 0 : index
    %c0_31 = arith.constant 0 : index
    %c0_32 = arith.constant 0 : index
    %27 = vector.load %arg2[%c0_30, %c0_31, %c0_32] : memref<1x8x8xbf16, #tpu.memory_space<vmem>>, vector<1x8x8xbf16>
    %28 = vector.shape_cast %27 : vector<1x8x8xbf16> to vector<8x8xbf16>
    %c0_33 = arith.constant 0 : index
    %c0_34 = arith.constant 0 : index
    %c0_35 = arith.constant 0 : index
    %29 = vector.load %arg3[%c0_33, %c0_34, %c0_35] : memref<1x8x1xbf16, #tpu.memory_space<vmem>>, vector<1x8x1xbf16>
    %30 = vector.shape_cast %29 : vector<1x8x1xbf16> to vector<8x1xbf16>
    %cst = arith.constant dense<0.000000e+00> : vector<8x20xf32>
    %31 = tpu.matmul %26, %10, %cst {dimension_numbers = #tpu.dot_dimension_numbers<[1], [0], [0], [1], [0, 0, 1, 1], [], []>} : vector<8x32xbf16>, vector<32x20xbf16>, vector<8x20xf32> -> vector<8x20xf32>
    %32 = vector.broadcast %11 : vector<1x20xf32> to vector<8x20xf32>
    %33 = arith.addf %31, %32 : vector<8x20xf32>
    %cst_36 = arith.constant dense<0xFF800000> : vector<8xf32>
    %34 = vector.multi_reduction <maximumf>, %33, %cst_36 [1] : vector<8x20xf32> to vector<8xf32>
    %35 = vector.shape_cast %34 : vector<8xf32> to vector<8x1xf32>
    %36 = vector.broadcast %35 : vector<8x1xf32> to vector<8x20xf32>
    %37 = arith.subf %33, %36 : vector<8x20xf32>
    %38 = math.exp %37 : vector<8x20xf32>
    %cst_37 = arith.constant dense<0.000000e+00> : vector<8xf32>
    %39 = vector.multi_reduction <add>, %38, %cst_37 [1] : vector<8x20xf32> to vector<8xf32>
    %40 = vector.shape_cast %39 : vector<8xf32> to vector<8x1xf32>
    %41 = tpu.reciprocal %40 {approx = true} : vector<8x1xf32> -> vector<8x1xf32>
    %42 = vector.broadcast %41 : vector<8x1xf32> to vector<8x20xf32>
    %43 = arith.mulf %38, %42 : vector<8x20xf32>
    %44 = vector.broadcast %30 : vector<8x1xbf16> to vector<8x32xbf16>
    %45 = arith.mulf %26, %44 : vector<8x32xbf16>
    %46 = arith.extf %30 : vector<8x1xbf16> to vector<8x1xf32>
    %47 = vector.broadcast %46 : vector<8x1xf32> to vector<8x20xf32>
    %48 = arith.mulf %43, %47 : vector<8x20xf32>
    %49 = arith.truncf %48 : vector<8x20xf32> to vector<8x20xbf16>
    %cst_38 = arith.constant dense<0.000000e+00> : vector<20x32xf32>
    %50 = tpu.matmul %49, %45, %cst_38 {dimension_numbers = #tpu.dot_dimension_numbers<[0], [0], [1], [1], [0, 1, 1, 1], [], []>} : vector<8x20xbf16>, vector<8x32xbf16>, vector<20x32xf32> -> vector<20x32xf32>
    %51 = arith.truncf %48 : vector<8x20xf32> to vector<8x20xbf16>
    %cst_39 = arith.constant dense<0.000000e+00> : vector<8x20xf32>
    %52 = tpu.matmul %28, %51, %cst_39 {dimension_numbers = #tpu.dot_dimension_numbers<[1], [0], [0], [1], [0, 0, 1, 1], [], []>} : vector<8x8xbf16>, vector<8x20xbf16>, vector<8x20xf32> -> vector<8x20xf32>
    %53 = arith.truncf %48 : vector<8x20xf32> to vector<8x20xbf16>
    %54 = arith.truncf %52 : vector<8x20xf32> to vector<8x20xbf16>
    %cst_40 = arith.constant dense<0.000000e+00> : vector<20x20xf32>
    %55 = tpu.matmul %53, %54, %cst_40 {dimension_numbers = #tpu.dot_dimension_numbers<[0], [0], [1], [1], [0, 1, 1, 1], [], []>} : vector<8x20xbf16>, vector<8x20xbf16>, vector<20x20xf32> -> vector<20x20xf32>
    %56 = arith.mulf %52, %48 : vector<8x20xf32>
    %57 = vector.shape_cast %56 : vector<8x20xf32> to vector<1x8x20xf32>
    %cst_41 = arith.constant dense<0.000000e+00> : vector<1xf32>
    %58 = vector.multi_reduction <add>, %57, %cst_41 [1, 2] : vector<1x8x20xf32> to vector<1xf32>
    %59 = vector.shape_cast %58 : vector<1xf32> to vector<1x1x1xf32>
    %60 = vector.extract %59[0, 0, 0] : f32 from vector<1x1x1xf32>
    %61 = arith.extf %28 : vector<8x8xbf16> to vector<8x8xf32>
    %cst_42 = arith.constant dense<0.000000e+00> : vector<8xf32>
    %62 = vector.multi_reduction <add>, %61, %cst_42 [1] : vector<8x8xf32> to vector<8xf32>
    %63 = vector.shape_cast %62 : vector<8xf32> to vector<8x1xf32>
    %64 = vector.broadcast %63 : vector<8x1xf32> to vector<8x20xf32>
    %65 = arith.mulf %64, %48 : vector<8x20xf32>
    %66 = arith.mulf %65, %48 : vector<8x20xf32>
    %67 = vector.shape_cast %66 : vector<8x20xf32> to vector<1x8x20xf32>
    %cst_43 = arith.constant dense<0.000000e+00> : vector<1xf32>
    %68 = vector.multi_reduction <add>, %67, %cst_43 [1, 2] : vector<1x8x20xf32> to vector<1xf32>
    %69 = vector.shape_cast %68 : vector<1xf32> to vector<1x1x1xf32>
    %70 = vector.extract %69[0, 0, 0] : f32 from vector<1x1x1xf32>
    %cst_44 = arith.constant 1.000000e-15 : f32
    %71 = arith.addf %70, %cst_44 : f32
    %72 = arith.divf %60, %71 : f32
    %cst_45 = arith.constant 0.000000e+00 : f32
    %73 = arith.subf %cst_45, %72 : f32
    %74 = arith.truncf %48 : vector<8x20xf32> to vector<8x20xbf16>
    %75 = arith.truncf %48 : vector<8x20xf32> to vector<8x20xbf16>
    %cst_46 = arith.constant dense<0.000000e+00> : vector<20x20xf32>
    %76 = tpu.matmul %74, %75, %cst_46 {dimension_numbers = #tpu.dot_dimension_numbers<[0], [0], [1], [1], [0, 1, 1, 1], [], []>} : vector<8x20xbf16>, vector<8x20xbf16>, vector<20x20xf32> -> vector<20x20xf32>
    %77 = arith.mulf %76, %76 : vector<20x20xf32>
    %78 = vector.shape_cast %77 : vector<20x20xf32> to vector<1x20x20xf32>
    %cst_47 = arith.constant dense<0.000000e+00> : vector<1xf32>
    %79 = vector.multi_reduction <add>, %78, %cst_47 [1, 2] : vector<1x20x20xf32> to vector<1xf32>
    %80 = vector.shape_cast %79 : vector<1xf32> to vector<1x1x1xf32>
    %81 = vector.extract %80[0, 0, 0] : f32 from vector<1x1x1xf32>
    %82 = math.sqrt %81 : f32
    %cst_48 = arith.constant 1.000000e-15 : f32
    %83 = arith.addf %82, %cst_48 : f32
    %84 = vector.broadcast %83 : f32 to vector<20x20xf32>
    %85 = arith.divf %76, %84 : vector<20x20xf32>
    %cst_49 = arith.constant 0.223606795 : f32
    %86 = vector.broadcast %cst_49 : f32 to vector<20x20xf32>
    %87 = arith.mulf %4, %86 : vector<20x20xf32>
    %88 = arith.subf %85, %87 : vector<20x20xf32>
    %89 = arith.mulf %88, %88 : vector<20x20xf32>
    %90 = vector.shape_cast %89 : vector<20x20xf32> to vector<1x20x20xf32>
    %cst_50 = arith.constant dense<0.000000e+00> : vector<1xf32>
    %91 = vector.multi_reduction <add>, %90, %cst_50 [1, 2] : vector<1x20x20xf32> to vector<1xf32>
    %92 = vector.shape_cast %91 : vector<1xf32> to vector<1x1x1xf32>
    %93 = vector.extract %92[0, 0, 0] : f32 from vector<1x1x1xf32>
    %94 = math.sqrt %93 : f32
    %cst_51 = arith.constant 1.000000e+00 : f32
    %95 = vector.broadcast %cst_51 : f32 to vector<20x20xf32>
    %96 = arith.subf %95, %4 : vector<20x20xf32>
    %97 = arith.mulf %55, %96 : vector<20x20xf32>
    %cst_52 = arith.constant dense<0.000000e+00> : vector<20xf32>
    %98 = vector.multi_reduction <add>, %97, %cst_52 [1] : vector<20x20xf32> to vector<20xf32>
    %99 = vector.shape_cast %98 : vector<20xf32> to vector<20x1xf32>
    %cst_53 = arith.constant dense<0.000000e+00> : vector<20xf32>
    %100 = vector.multi_reduction <add>, %97, %cst_53 [0] : vector<20x20xf32> to vector<20xf32>
    %101 = vector.shape_cast %100 : vector<20xf32> to vector<1x20xf32>
    %cst_54 = arith.constant 0.000000e+00 : f32
    %102 = vector.broadcast %cst_54 : f32 to vector<20x1xf32>
    %103 = arith.cmpf ogt, %99, %102 : vector<20x1xf32>
    %104 = math.sqrt %99 : vector<20x1xf32>
    %cst_55 = arith.constant 1.000000e-15 : f32
    %105 = vector.broadcast %cst_55 : f32 to vector<20x1xf32>
    %106 = arith.addf %104, %105 : vector<20x1xf32>
    %107 = tpu.reciprocal %106 {approx = true} : vector<20x1xf32> -> vector<20x1xf32>
    %cst_56 = arith.constant 0.000000e+00 : f32
    %108 = vector.broadcast %cst_56 : f32 to vector<20x1xf32>
    %109 = arith.select %103, %107, %108 : vector<20x1xi1>, vector<20x1xf32>
    %cst_57 = arith.constant 0.000000e+00 : f32
    %110 = vector.broadcast %cst_57 : f32 to vector<1x20xf32>
    %111 = arith.cmpf ogt, %101, %110 : vector<1x20xf32>
    %112 = math.sqrt %101 : vector<1x20xf32>
    %cst_58 = arith.constant 1.000000e-15 : f32
    %113 = vector.broadcast %cst_58 : f32 to vector<1x20xf32>
    %114 = arith.addf %112, %113 : vector<1x20xf32>
    %115 = tpu.reciprocal %114 {approx = true} : vector<1x20xf32> -> vector<1x20xf32>
    %cst_59 = arith.constant 0.000000e+00 : f32
    %116 = vector.broadcast %cst_59 : f32 to vector<1x20xf32>
    %117 = arith.select %111, %115, %116 : vector<1x20xi1>, vector<1x20xf32>
    %118 = vector.broadcast %109 : vector<20x1xf32> to vector<20x20xf32>
    %119 = arith.mulf %97, %118 : vector<20x20xf32>
    %120 = vector.broadcast %117 : vector<1x20xf32> to vector<20x20xf32>
    %121 = arith.mulf %119, %120 : vector<20x20xf32>
    %122 = arith.truncf %121 : vector<20x20xf32> to vector<20x20xbf16>
    %123 = arith.truncf %50 : vector<20x32xf32> to vector<20x32xbf16>
    %cst_60 = arith.constant dense<0.000000e+00> : vector<20x32xf32>
    %124 = tpu.matmul %122, %123, %cst_60 {dimension_numbers = #tpu.dot_dimension_numbers<[1], [0], [0], [1], [0, 0, 1, 1], [], []>} : vector<20x20xbf16>, vector<20x32xbf16>, vector<20x32xf32> -> vector<20x32xf32>
    %125 = arith.truncf %124 : vector<20x32xf32> to vector<20x32xbf16>
    %cst_61 = arith.constant dense<0.000000e+00> : vector<20x32xf32>
    %126 = tpu.matmul %125, %12, %cst_61 {dimension_numbers = #tpu.dot_dimension_numbers<[1], [0], [0], [1], [0, 0, 1, 1], [], []>} : vector<20x32xbf16>, vector<32x32xbf16>, vector<20x32xf32> -> vector<20x32xf32>
    %127 = vector.broadcast %13 : vector<1x32xf32> to vector<20x32xf32>
    %128 = arith.addf %126, %127 : vector<20x32xf32>
    %129 = arith.truncf %50 : vector<20x32xf32> to vector<20x32xbf16>
    %cst_62 = arith.constant dense<0.000000e+00> : vector<20x32xf32>
    %130 = tpu.matmul %129, %14, %cst_62 {dimension_numbers = #tpu.dot_dimension_numbers<[1], [0], [0], [1], [0, 0, 1, 1], [], []>} : vector<20x32xbf16>, vector<32x32xbf16>, vector<20x32xf32> -> vector<20x32xf32>
    %131 = arith.addf %128, %130 : vector<20x32xf32>
    %cst_63 = arith.constant 0.000000e+00 : f32
    %132 = vector.broadcast %cst_63 : f32 to vector<20x32xf32>
    %133 = arith.maximumf %131, %132 : vector<20x32xf32>
    %134 = arith.truncf %133 : vector<20x32xf32> to vector<20x32xbf16>
    %cst_64 = arith.constant dense<0.000000e+00> : vector<20x10xf32>
    %135 = tpu.matmul %134, %15, %cst_64 {dimension_numbers = #tpu.dot_dimension_numbers<[1], [0], [0], [1], [0, 0, 1, 1], [], []>} : vector<20x32xbf16>, vector<32x10xbf16>, vector<20x10xf32> -> vector<20x10xf32>
    %136 = vector.broadcast %16 : vector<1x10xf32> to vector<20x10xf32>
    %137 = arith.addf %135, %136 : vector<20x10xf32>
    %cst_65 = arith.constant dense<0xFF800000> : vector<20xf32>
    %138 = vector.multi_reduction <maximumf>, %137, %cst_65 [1] : vector<20x10xf32> to vector<20xf32>
    %139 = vector.shape_cast %138 : vector<20xf32> to vector<20x1xf32>
    %140 = vector.broadcast %139 : vector<20x1xf32> to vector<20x10xf32>
    %141 = arith.subf %137, %140 : vector<20x10xf32>
    %142 = math.exp %141 : vector<20x10xf32>
    %cst_66 = arith.constant dense<0.000000e+00> : vector<20xf32>
    %143 = vector.multi_reduction <add>, %142, %cst_66 [1] : vector<20x10xf32> to vector<20xf32>
    %144 = vector.shape_cast %143 : vector<20xf32> to vector<20x1xf32>
    %145 = tpu.reciprocal %144 {approx = true} : vector<20x1xf32> -> vector<20x1xf32>
    %146 = vector.broadcast %145 : vector<20x1xf32> to vector<20x10xf32>
    %147 = arith.mulf %142, %146 : vector<20x10xf32>
    %148 = arith.truncf %147 : vector<20x10xf32> to vector<20x10xbf16>
    %149 = arith.truncf %133 : vector<20x32xf32> to vector<20x32xbf16>
    %cst_67 = arith.constant dense<0.000000e+00> : vector<10x32xf32>
    %150 = tpu.matmul %148, %149, %cst_67 {dimension_numbers = #tpu.dot_dimension_numbers<[0], [0], [1], [1], [0, 1, 1, 1], [], []>} : vector<20x10xbf16>, vector<20x32xbf16>, vector<10x32xf32> -> vector<10x32xf32>
    %151 = arith.truncf %121 : vector<20x20xf32> to vector<20x20xbf16>
    %152 = arith.truncf %147 : vector<20x10xf32> to vector<20x10xbf16>
    %cst_68 = arith.constant dense<0.000000e+00> : vector<20x10xf32>
    %153 = tpu.matmul %151, %152, %cst_68 {dimension_numbers = #tpu.dot_dimension_numbers<[1], [0], [0], [1], [0, 0, 1, 1], [], []>} : vector<20x20xbf16>, vector<20x10xbf16>, vector<20x10xf32> -> vector<20x10xf32>
    %154 = arith.truncf %147 : vector<20x10xf32> to vector<20x10xbf16>
    %155 = arith.truncf %153 : vector<20x10xf32> to vector<20x10xbf16>
    %cst_69 = arith.constant dense<0.000000e+00> : vector<10x10xf32>
    %156 = tpu.matmul %154, %155, %cst_69 {dimension_numbers = #tpu.dot_dimension_numbers<[0], [0], [1], [1], [0, 1, 1, 1], [], []>} : vector<20x10xbf16>, vector<20x10xbf16>, vector<10x10xf32> -> vector<10x10xf32>
    %157 = arith.mulf %153, %147 : vector<20x10xf32>
    %158 = vector.shape_cast %157 : vector<20x10xf32> to vector<1x20x10xf32>
    %cst_70 = arith.constant dense<0.000000e+00> : vector<1xf32>
    %159 = vector.multi_reduction <add>, %158, %cst_70 [1, 2] : vector<1x20x10xf32> to vector<1xf32>
    %160 = vector.shape_cast %159 : vector<1xf32> to vector<1x1x1xf32>
    %161 = vector.extract %160[0, 0, 0] : f32 from vector<1x1x1xf32>
    %cst_71 = arith.constant dense<0.000000e+00> : vector<20xf32>
    %162 = vector.multi_reduction <add>, %121, %cst_71 [1] : vector<20x20xf32> to vector<20xf32>
    %163 = vector.shape_cast %162 : vector<20xf32> to vector<20x1xf32>
    %164 = vector.broadcast %163 : vector<20x1xf32> to vector<20x10xf32>
    %165 = arith.mulf %164, %147 : vector<20x10xf32>
    %166 = arith.mulf %165, %147 : vector<20x10xf32>
    %167 = vector.shape_cast %166 : vector<20x10xf32> to vector<1x20x10xf32>
    %cst_72 = arith.constant dense<0.000000e+00> : vector<1xf32>
    %168 = vector.multi_reduction <add>, %167, %cst_72 [1, 2] : vector<1x20x10xf32> to vector<1xf32>
    %169 = vector.shape_cast %168 : vector<1xf32> to vector<1x1x1xf32>
    %170 = vector.extract %169[0, 0, 0] : f32 from vector<1x1x1xf32>
    %cst_73 = arith.constant 1.000000e-15 : f32
    %171 = arith.addf %170, %cst_73 : f32
    %172 = arith.divf %161, %171 : f32
    %cst_74 = arith.constant 0.000000e+00 : f32
    %173 = arith.subf %cst_74, %172 : f32
    %174 = arith.truncf %147 : vector<20x10xf32> to vector<20x10xbf16>
    %175 = arith.truncf %147 : vector<20x10xf32> to vector<20x10xbf16>
    %cst_75 = arith.constant dense<0.000000e+00> : vector<10x10xf32>
    %176 = tpu.matmul %174, %175, %cst_75 {dimension_numbers = #tpu.dot_dimension_numbers<[0], [0], [1], [1], [0, 1, 1, 1], [], []>} : vector<20x10xbf16>, vector<20x10xbf16>, vector<10x10xf32> -> vector<10x10xf32>
    %177 = arith.mulf %176, %176 : vector<10x10xf32>
    %178 = vector.shape_cast %177 : vector<10x10xf32> to vector<1x10x10xf32>
    %cst_76 = arith.constant dense<0.000000e+00> : vector<1xf32>
    %179 = vector.multi_reduction <add>, %178, %cst_76 [1, 2] : vector<1x10x10xf32> to vector<1xf32>
    %180 = vector.shape_cast %179 : vector<1xf32> to vector<1x1x1xf32>
    %181 = vector.extract %180[0, 0, 0] : f32 from vector<1x1x1xf32>
    %182 = math.sqrt %181 : f32
    %cst_77 = arith.constant 1.000000e-15 : f32
    %183 = arith.addf %182, %cst_77 : f32
    %184 = vector.broadcast %183 : f32 to vector<10x10xf32>
    %185 = arith.divf %176, %184 : vector<10x10xf32>
    %cst_78 = arith.constant 0.316227764 : f32
    %186 = vector.broadcast %cst_78 : f32 to vector<10x10xf32>
    %187 = arith.mulf %9, %186 : vector<10x10xf32>
    %188 = arith.subf %185, %187 : vector<10x10xf32>
    %189 = arith.mulf %188, %188 : vector<10x10xf32>
    %190 = vector.shape_cast %189 : vector<10x10xf32> to vector<1x10x10xf32>
    %cst_79 = arith.constant dense<0.000000e+00> : vector<1xf32>
    %191 = vector.multi_reduction <add>, %190, %cst_79 [1, 2] : vector<1x10x10xf32> to vector<1xf32>
    %192 = vector.shape_cast %191 : vector<1xf32> to vector<1x1x1xf32>
    %193 = vector.extract %192[0, 0, 0] : f32 from vector<1x1x1xf32>
    %194 = math.sqrt %193 : f32
    %cst_80 = arith.constant 1.000000e+00 : f32
    %195 = vector.broadcast %cst_80 : f32 to vector<10x10xf32>
    %196 = arith.subf %195, %9 : vector<10x10xf32>
    %197 = arith.mulf %156, %196 : vector<10x10xf32>
    %cst_81 = arith.constant dense<0.000000e+00> : vector<10xf32>
    %198 = vector.multi_reduction <add>, %197, %cst_81 [1] : vector<10x10xf32> to vector<10xf32>
    %199 = vector.shape_cast %198 : vector<10xf32> to vector<10x1xf32>
    %cst_82 = arith.constant dense<0.000000e+00> : vector<10xf32>
    %200 = vector.multi_reduction <add>, %197, %cst_82 [0] : vector<10x10xf32> to vector<10xf32>
    %201 = vector.shape_cast %200 : vector<10xf32> to vector<1x10xf32>
    %cst_83 = arith.constant 0.000000e+00 : f32
    %202 = vector.broadcast %cst_83 : f32 to vector<10x1xf32>
    %203 = arith.cmpf ogt, %199, %202 : vector<10x1xf32>
    %204 = math.sqrt %199 : vector<10x1xf32>
    %cst_84 = arith.constant 1.000000e-15 : f32
    %205 = vector.broadcast %cst_84 : f32 to vector<10x1xf32>
    %206 = arith.addf %204, %205 : vector<10x1xf32>
    %207 = tpu.reciprocal %206 {approx = true} : vector<10x1xf32> -> vector<10x1xf32>
    %cst_85 = arith.constant 0.000000e+00 : f32
    %208 = vector.broadcast %cst_85 : f32 to vector<10x1xf32>
    %209 = arith.select %203, %207, %208 : vector<10x1xi1>, vector<10x1xf32>
    %cst_86 = arith.constant 0.000000e+00 : f32
    %210 = vector.broadcast %cst_86 : f32 to vector<1x10xf32>
    %211 = arith.cmpf ogt, %201, %210 : vector<1x10xf32>
    %212 = math.sqrt %201 : vector<1x10xf32>
    %cst_87 = arith.constant 1.000000e-15 : f32
    %213 = vector.broadcast %cst_87 : f32 to vector<1x10xf32>
    %214 = arith.addf %212, %213 : vector<1x10xf32>
    %215 = tpu.reciprocal %214 {approx = true} : vector<1x10xf32> -> vector<1x10xf32>
    %cst_88 = arith.constant 0.000000e+00 : f32
    %216 = vector.broadcast %cst_88 : f32 to vector<1x10xf32>
    %217 = arith.select %211, %215, %216 : vector<1x10xi1>, vector<1x10xf32>
    %218 = vector.broadcast %209 : vector<10x1xf32> to vector<10x10xf32>
    %219 = arith.mulf %197, %218 : vector<10x10xf32>
    %220 = vector.broadcast %217 : vector<1x10xf32> to vector<10x10xf32>
    %221 = arith.mulf %219, %220 : vector<10x10xf32>
    %222 = arith.truncf %221 : vector<10x10xf32> to vector<10x10xbf16>
    %223 = arith.truncf %150 : vector<10x32xf32> to vector<10x32xbf16>
    %cst_89 = arith.constant dense<0.000000e+00> : vector<10x32xf32>
    %224 = tpu.matmul %222, %223, %cst_89 {dimension_numbers = #tpu.dot_dimension_numbers<[1], [0], [0], [1], [0, 0, 1, 1], [], []>} : vector<10x10xbf16>, vector<10x32xbf16>, vector<10x32xf32> -> vector<10x32xf32>
    %225 = arith.truncf %224 : vector<10x32xf32> to vector<10x32xbf16>
    %cst_90 = arith.constant dense<0.000000e+00> : vector<10x32xf32>
    %226 = tpu.matmul %225, %17, %cst_90 {dimension_numbers = #tpu.dot_dimension_numbers<[1], [0], [0], [1], [0, 0, 1, 1], [], []>} : vector<10x32xbf16>, vector<32x32xbf16>, vector<10x32xf32> -> vector<10x32xf32>
    %227 = vector.broadcast %18 : vector<1x32xf32> to vector<10x32xf32>
    %228 = arith.addf %226, %227 : vector<10x32xf32>
    %229 = arith.truncf %150 : vector<10x32xf32> to vector<10x32xbf16>
    %cst_91 = arith.constant dense<0.000000e+00> : vector<10x32xf32>
    %230 = tpu.matmul %229, %19, %cst_91 {dimension_numbers = #tpu.dot_dimension_numbers<[1], [0], [0], [1], [0, 0, 1, 1], [], []>} : vector<10x32xbf16>, vector<32x32xbf16>, vector<10x32xf32> -> vector<10x32xf32>
    %231 = arith.addf %228, %230 : vector<10x32xf32>
    %cst_92 = arith.constant dense<0.000000e+00> : vector<32xf32>
    %232 = vector.multi_reduction <add>, %231, %cst_92 [0] : vector<10x32xf32> to vector<32xf32>
    %233 = vector.shape_cast %232 : vector<32xf32> to vector<1x32xf32>
    %cst_93 = arith.constant 1.000000e+01 : f32
    %234 = vector.broadcast %cst_93 : f32 to vector<1x32xf32>
    %235 = arith.divf %233, %234 : vector<1x32xf32>
    %236 = arith.truncf %235 : vector<1x32xf32> to vector<1x32xbf16>
    %cst_94 = arith.constant dense<0.000000e+00> : vector<1x32xf32>
    %237 = tpu.matmul %236, %20, %cst_94 {dimension_numbers = #tpu.dot_dimension_numbers<[1], [0], [0], [1], [0, 0, 1, 1], [], []>} : vector<1x32xbf16>, vector<32x32xbf16>, vector<1x32xf32> -> vector<1x32xf32>
    %238 = arith.addf %237, %21 : vector<1x32xf32>
    %cst_95 = arith.constant 0.000000e+00 : f32
    %239 = vector.broadcast %cst_95 : f32 to vector<1x32xf32>
    %240 = arith.maximumf %238, %239 : vector<1x32xf32>
    %241 = arith.truncf %240 : vector<1x32xf32> to vector<1x32xbf16>
    %cst_96 = arith.constant dense<0.000000e+00> : vector<1x16xf32>
    %242 = tpu.matmul %241, %22, %cst_96 {dimension_numbers = #tpu.dot_dimension_numbers<[1], [0], [0], [1], [0, 0, 1, 1], [], []>} : vector<1x32xbf16>, vector<32x16xbf16>, vector<1x16xf32> -> vector<1x16xf32>
    %243 = arith.addf %242, %23 : vector<1x16xf32>
    %c12_i32 = arith.constant 12 : i32
    %244 = vector.broadcast %c12_i32 : i32 to vector<1x16xi32>
    %245 = arith.cmpi eq, %24, %244 : vector<1x16xi32>
    %cst_97 = arith.constant 0.000000e+00 : f32
    %246 = vector.broadcast %73 : f32 to vector<1x16xf32>
    %247 = vector.broadcast %cst_97 : f32 to vector<1x16xf32>
    %248 = arith.select %245, %246, %247 : vector<1x16xi1>, vector<1x16xf32>
    %249 = arith.addf %243, %248 : vector<1x16xf32>
    %c13_i32 = arith.constant 13 : i32
    %250 = vector.broadcast %c13_i32 : i32 to vector<1x16xi32>
    %251 = arith.cmpi eq, %24, %250 : vector<1x16xi32>
    %cst_98 = arith.constant 0.000000e+00 : f32
    %252 = vector.broadcast %94 : f32 to vector<1x16xf32>
    %253 = vector.broadcast %cst_98 : f32 to vector<1x16xf32>
    %254 = arith.select %251, %252, %253 : vector<1x16xi1>, vector<1x16xf32>
    %255 = arith.addf %249, %254 : vector<1x16xf32>
    %c14_i32 = arith.constant 14 : i32
    %256 = vector.broadcast %c14_i32 : i32 to vector<1x16xi32>
    %257 = arith.cmpi eq, %24, %256 : vector<1x16xi32>
    %cst_99 = arith.constant 0.000000e+00 : f32
    %258 = vector.broadcast %173 : f32 to vector<1x16xf32>
    %259 = vector.broadcast %cst_99 : f32 to vector<1x16xf32>
    %260 = arith.select %257, %258, %259 : vector<1x16xi1>, vector<1x16xf32>
    %261 = arith.addf %255, %260 : vector<1x16xf32>
    %c15_i32 = arith.constant 15 : i32
    %262 = vector.broadcast %c15_i32 : i32 to vector<1x16xi32>
    %263 = arith.cmpi eq, %24, %262 : vector<1x16xi32>
    %cst_100 = arith.constant 0.000000e+00 : f32
    %264 = vector.broadcast %194 : f32 to vector<1x16xf32>
    %265 = vector.broadcast %cst_100 : f32 to vector<1x16xf32>
    %266 = arith.select %263, %264, %265 : vector<1x16xi1>, vector<1x16xf32>
    %267 = arith.addf %261, %266 : vector<1x16xf32>
    %c0_101 = arith.constant 0 : index
    %c0_102 = arith.constant 0 : index
    %c0_103 = arith.constant 0 : index
    %268 = vector.load %arg18[%c0_101, %c0_102, %c0_103] : memref<1x1x16xf32, #tpu.memory_space<vmem>>, vector<1x1x16xf32>
    %269 = vector.shape_cast %268 : vector<1x1x16xf32> to vector<1x16xf32>
    %270 = vector.shape_cast %267 : vector<1x16xf32> to vector<1x1x16xf32>
    tpu.vector_store %arg18[%c0_101, %c0_102, %c0_103], %270 {strides = array<i32>} : memref<1x1x16xf32, #tpu.memory_space<vmem>>, vector<1x1x16xf32>,
    return
  }
  func.func @transform_0(%arg0: i32) -> (i32, i32, i32) {
    %c0_i32 = arith.constant 0 : i32
    %c0_i32_0 = arith.constant 0 : i32
    %c0_i32_1 = arith.constant 0 : i32
    return %arg0, %c0_i32, %c0_i32_0 : i32, i32, i32
  }
  func.func @transform_1(%arg0: i32) -> (i32, i32, i32) {
    %c0_i32 = arith.constant 0 : i32
    %c0_i32_0 = arith.constant 0 : i32
    %c0_i32_1 = arith.constant 0 : i32
    return %arg0, %c0_i32, %c0_i32_0 : i32, i32, i32
  }
  func.func @transform_2(%arg0: i32) -> (i32, i32, i32) {
    %c0_i32 = arith.constant 0 : i32
    %c0_i32_0 = arith.constant 0 : i32
    %c0_i32_1 = arith.constant 0 : i32
    return %arg0, %c0_i32, %c0_i32_0 : i32, i32, i32
  }
  func.func @transform_3(%arg0: i32) -> (i32, i32) {
    %c0_i32 = arith.constant 0 : i32
    %c0_i32_0 = arith.constant 0 : i32
    %c0_i32_1 = arith.constant 0 : i32
    return %c0_i32, %c0_i32_0 : i32, i32
  }
  func.func @transform_4(%arg0: i32) -> (i32, i32) {
    %c0_i32 = arith.constant 0 : i32
    %c0_i32_0 = arith.constant 0 : i32
    %c0_i32_1 = arith.constant 0 : i32
    return %c0_i32, %c0_i32_0 : i32, i32
  }
  func.func @transform_5(%arg0: i32) -> (i32, i32) {
    %c0_i32 = arith.constant 0 : i32
    %c0_i32_0 = arith.constant 0 : i32
    %c0_i32_1 = arith.constant 0 : i32
    return %c0_i32, %c0_i32_0 : i32, i32
  }
  func.func @transform_6(%arg0: i32) -> (i32, i32) {
    %c0_i32 = arith.constant 0 : i32
    %c0_i32_0 = arith.constant 0 : i32
    %c0_i32_1 = arith.constant 0 : i32
    return %c0_i32, %c0_i32_0 : i32, i32
  }
  func.func @transform_7(%arg0: i32) -> (i32, i32) {
    %c0_i32 = arith.constant 0 : i32
    %c0_i32_0 = arith.constant 0 : i32
    %c0_i32_1 = arith.constant 0 : i32
    return %c0_i32, %c0_i32_0 : i32, i32
  }
  func.func @transform_8(%arg0: i32) -> (i32, i32) {
    %c0_i32 = arith.constant 0 : i32
    %c0_i32_0 = arith.constant 0 : i32
    %c0_i32_1 = arith.constant 0 : i32
    return %c0_i32, %c0_i32_0 : i32, i32
  }
  func.func @transform_9(%arg0: i32) -> (i32, i32) {
    %c0_i32 = arith.constant 0 : i32
    %c0_i32_0 = arith.constant 0 : i32
    %c0_i32_1 = arith.constant 0 : i32
    return %c0_i32, %c0_i32_0 : i32, i32
  }
  func.func @transform_10(%arg0: i32) -> (i32, i32) {
    %c0_i32 = arith.constant 0 : i32
    %c0_i32_0 = arith.constant 0 : i32
    %c0_i32_1 = arith.constant 0 : i32
    return %c0_i32, %c0_i32_0 : i32, i32
  }
  func.func @transform_11(%arg0: i32) -> (i32, i32) {
    %c0_i32 = arith.constant 0 : i32
    %c0_i32_0 = arith.constant 0 : i32
    %c0_i32_1 = arith.constant 0 : i32
    return %c0_i32, %c0_i32_0 : i32, i32
  }
  func.func @transform_12(%arg0: i32) -> (i32, i32) {
    %c0_i32 = arith.constant 0 : i32
    %c0_i32_0 = arith.constant 0 : i32
    %c0_i32_1 = arith.constant 0 : i32
    return %c0_i32, %c0_i32_0 : i32, i32
  }
  func.func @transform_13(%arg0: i32) -> (i32, i32) {
    %c0_i32 = arith.constant 0 : i32
    %c0_i32_0 = arith.constant 0 : i32
    %c0_i32_1 = arith.constant 0 : i32
    return %c0_i32, %c0_i32_0 : i32, i32
  }
  func.func @transform_14(%arg0: i32) -> (i32, i32) {
    %c0_i32 = arith.constant 0 : i32
    %c0_i32_0 = arith.constant 0 : i32
    %c0_i32_1 = arith.constant 0 : i32
    return %c0_i32, %c0_i32_0 : i32, i32
  }
  func.func @transform_15(%arg0: i32) -> (i32, i32) {
    %c0_i32 = arith.constant 0 : i32
    %c0_i32_0 = arith.constant 0 : i32
    %c0_i32_1 = arith.constant 0 : i32
    return %c0_i32, %c0_i32_0 : i32, i32
  }
  func.func @transform_16(%arg0: i32) -> (i32, i32) {
    %c0_i32 = arith.constant 0 : i32
    %c0_i32_0 = arith.constant 0 : i32
    %c0_i32_1 = arith.constant 0 : i32
    return %c0_i32, %c0_i32_0 : i32, i32
  }
  func.func @transform_17(%arg0: i32) -> (i32, i32, i32) {
    %c0_i32 = arith.constant 0 : i32
    %c0_i32_0 = arith.constant 0 : i32
    %c0_i32_1 = arith.constant 0 : i32
    return %arg0, %c0_i32, %c0_i32_0 : i32, i32, i32
  }
}

</mosaic_0001>

<bundles_post_ra>
// kernel: mincut_pool_forward.2
= control target key start
LH: loop header
LB: loop body
LE: loop exit
PB: predicated region body
PF: predicated region fallthrough
CT: control target
= control target key end

     0   :  { %vm19_vm0 = vcmask 261120   ;;  %v140_v0 = vmov 0.0   ;;  %vm141_vm1 = vmmov 0   ;;  %vm39_vm2 = vcmask 130048   ;;  %s181_s1 = inlined_call_operand.vmem [shape: bf16[16,32], index: 1, kind: input, shape index: {}]   ;;  %s182_s0 = inlined_call_operand.vmem [shape: bf16[16,16], index: 0, kind: input, shape index: {}]   ;;  %s183_s2 = inlined_call_operand.vmem [shape: f32[1,32], index: 2, kind: input, shape index: {}]   ;;  %s184_s3 = inlined_call_operand.vmem [shape: bf16[16,32], index: 3, kind: output, shape index: {}]  }
   0x1   :  { %20 = vst.msk [vmem:[#allocation2] sm:$0xff] %vm19_vm0, %v140_v0  ;;  %21 = vst.msk [vmem:[#allocation2 + $0x8] sm:$0xff] %vm19_vm0, %v140_v0  ;;  %130 = vmatprep.subr.bf16.mxu0 %v140_v0  ;;  %v138_v1 = vld [vmem:[%s181_s1] sm:$0xff]   ;;  %132 = vmatprep.mubr.msk.bf16.mxu0 %vm141_vm1, %v140_v0  ;;  %vm113_vm3 = vcmask 257024  }
   0x2   :  { %v139_v2 = vld [vmem:[%s182_s0] sm:$0xff]   ;;  %131 = vmatpush3.bf16.msra.mxu0 %v138_v1 }
   0x3   :  { %v123_v11 = vld [vmem:[%s183_s2] ss:$0 sm:$0xff] }
   0x5   :  { %133 = vmatmul.mubr.msk.bf16.vlgmr.msra.gmra.mxu0 %vm39_vm2, %v139_v2 }
   0x8   :  { %v22_v3 = vld [vmem:[#allocation2] sm:$0xff]  ;;  %v23_v7 = vld [vmem:[#allocation2 + $0x8] sm:$0xff] }
  0xc5   :  { %v77_v4 = vpop.f32.mrf.mxu0 }
  0xc6   :  { %v84_v5 = vadd.f32 %v77_v4, %v22_v3 }
  0xc7   :  { %v134_v6 = vpop.f32.mrf.mxu0 }
  0xc8   :  { %87 = vst.msk [vmem:[#allocation2] sm:$0xff] %vm19_vm0, %v84_v5 }
  0xc9   :  { %v80_v8 = vpop.f32.mrf.mxu0 }
  0xca   :  { %v85_v9 = vadd.f32 %v80_v8, %v23_v7 }
  0xcb   :  { %v135_v10 = vpop.f32.mrf.mxu0 }
  0xcc   :  { %88 = vst.msk [vmem:[#allocation2 + $0x8] sm:$0xff] %vm19_vm0, %v85_v9 }
  0xcf   :  { %v92_v12 = vld [vmem:[#allocation2] sm:$0xff] }
  0xd0   :  { %v101_v13 = vadd.f32 %v123_v11, %v92_v12 }
  0xd2   :  { %v103_v14 = vmax.f32 %v101_v13, 0.0 }
  0xd3   :  { %v93_v15 = vld [vmem:[#allocation2 + $0x8] sm:$0xff] }
  0xd4   :  { %v126_v16 = vpack.c.bf16 %v103_v14, %v103_v14  ;;  %v102_v17 = vadd.f32 %v123_v11, %v93_v15 }
  0xd6   :  { %114 = vst.msk [vmem:[%s184_s3] sm:$0xf] %vm113_vm3, %v126_v16  ;;  %v104_v18 = vmax.f32 %v102_v17, 0.0 }
  0xd8   :  { %v127_v19 = vpack.c.bf16 %v104_v18, %v104_v18 }
  0xda   :  { %115 = vst.msk [vmem:[%s184_s3 + $0x4] sm:$0xf] %vm113_vm3, %v127_v19 }

// kernel: mincut_pool_forward.3
= control target key start
LH: loop header
LB: loop body
LE: loop exit
PB: predicated region body
PF: predicated region fallthrough
CT: control target
= control target key end

     0   :  { %s2657_s24 = smov 0   ;;  %s3042_s0 = inlined_call_operand.vmem [shape: bf16[2,8,32], index: 0, kind: input, shape index: {}]   ;;  %s3043_s1 = inlined_call_operand.vmem [shape: bf16[2,8,8], index: 1, kind: input, shape index: {}]   ;;  %s3044_s2 = inlined_call_operand.vmem [shape: bf16[2,8,1], index: 2, kind: input, shape index: {}]   ;;  %s3045_s3 = inlined_call_operand.vmem [shape: bf16[32,20], index: 3, kind: input, shape index: {}]   ;;  %s3046_s4 = inlined_call_operand.vmem [shape: f32[1,20], index: 4, kind: input, shape index: {}]   ;;  %s3047_s5 = inlined_call_operand.vmem [shape: bf16[32,32], index: 5, kind: input, shape index: {}]   ;;  %s3048_s6 = inlined_call_operand.vmem [shape: f32[1,32], index: 6, kind: input, shape index: {}]   ;;  %s3049_s7 = inlined_call_operand.vmem [shape: bf16[32,32], index: 7, kind: input, shape index: {}]   ;;  %s3050_s8 = inlined_call_operand.vmem [shape: bf16[32,10], index: 8, kind: input, shape index: {}]   ;;  %s3051_s9 = inlined_call_operand.vmem [shape: f32[1,10], index: 9, kind: input, shape index: {}]   ;;  %s3052_s10 = inlined_call_operand.vmem [shape: bf16[32,32], index: 10, kind: input, shape index: {}]   ;;  %s3053_s11 = inlined_call_operand.vmem [shape: f32[1,32], index: 11, kind: input, shape index: {}]   ;;  %s3054_s12 = inlined_call_operand.vmem [shape: bf16[32,32], index: 12, kind: input, shape index: {}]   ;;  %s3055_s13 = inlined_call_operand.vmem [shape: bf16[32,32], index: 13, kind: input, shape index: {}]   ;;  %s3056_s14 = inlined_call_operand.vmem [shape: f32[1,32], index: 14, kind: input, shape index: {}]   ;;  %s3057_s15 = inlined_call_operand.vmem [shape: bf16[32,16], index: 15, kind: input, shape index: {}]   ;;  %s3058_s16 = inlined_call_operand.vmem [shape: f32[1,16], index: 16, kind: input, shape index: {}]   ;;  %s3059_s17 = inlined_call_operand.vmem [shape: f32[2,1,16], index: 17, kind: output, shape index: {}]  }
   0x1   :  { %3060 = sst [smem:[#allocation2_spill]] %s3042_s0 }
   0x2   :  { %3061 = sst [smem:[#allocation3_spill]] %s3043_s1 }
   0x3 LB: > { %s2182_s25 = sadd.s32 4294967295, %s2561_s24   ;;  %p2186_p0 = scmp.ge.s32.totalorder %s2561_s24, 1  ;;  %s2561_s24 = sphi %s2657_s24, %s27_s24  }
   0x4   : > { %p504_p1 = scmp.lt.s32.totalorder %s2561_s24, 3 }
   0x6   : > { %p505_p2 = pnand %p2186_p0, %p504_p1 }
   0x7   : > { %p561_p3 = scmp.lt.s32.totalorder (!%p505_p2), %s2182_s25, 1  ;;  %s3062_s19 = sld [smem:[#allocation2_spill]] (!%p505_p2) }
   0x8   : > { %508 = sbr.rel (%p505_p2) target bundleno = 3644 (0xe3c), region = 88  ;;  %s3063_s29 = sld [smem:[#allocation3_spill]] (!%p505_p2) }
   0xd   : > { %v2479_v0 = vld [vmem:[%s3045_s3 + $0x8] sm:$0xff]   ;;  %v2563_v1 = vmov 0.0   ;;  %v2480_v2 = vld [vmem:[%s3045_s3] sm:$0xff]   ;;  %vm2564_vm0 = vmmov 0   ;;  %s3065_s25 = smov (!%p561_p3, %s2182_s25), 1  ;;  %vm651_vm1 = vcmask 261120   ;;  %v577_v20 = vlaneseq }
   0xe   : > { %2298 = vmatprep.subr.bf16.mxu0 %v2563_v1  ;;  %2302 = vmatprep.mubr.msk.bf16.mxu0 %vm2564_vm0, %v2563_v1  ;;  %s2678_s0 = sshll.u32 %s3065_s25, 2  ;;  %v2193_v4 = vld [vmem:[%s3046_s4] ss:$0 sm:$0xff]  ;;  %vm695_vm2 = vcmask 162816   ;;  %v2565_v11 = vmov 0   ;;  %vm751_vm3 = vcmask 1043456  }
   0xf   : > { %2299 = vmatpush3.bf16.msra.mxu0 %v2479_v0  ;;  %s564_s1 = scalar_lea.vmem %s3062_s19, %s2678_s0  ;;  %s572_s26 = scalar_lea.vmem %s3044_s2, %s2678_s0  ;;  %2477 = vset.pattern.permute.xlu1 %v2565_v11  ;;  %v2566_v21 = vmov 839922192   ;;  %v2695_v23 = vshrl.u32 %v577_v20, 7  ;;  %vm744_vm4 = vcmask 64512   ;;  %vm1130_vm5 = vcmask 1041408  }
  0x10   : > { %2300 = vmatprep.subr.bf16.mxu0 %v2563_v1  ;;  %v630_v3 = vld [vmem:[%s564_s1] sm:$0xf]  ;;  %v713_v22 = vunpack.c.l.s4 %v2566_v21  ;;  %s568_s30 = scalar_lea.vmem %s3063_s29, %s2678_s0  ;;  %v2743_v55 = vand.u32 127, %v577_v20  ;;  %vm988_vm9 = vcmask 158720  }
  0x11   : > { %v632_v12 = vld [vmem:[%s572_s26] sm:$0xf]  ;;  %v580_v56 = vadd.s32 16, %v2695_v23  ;;  %v579_v57 = vadd.s32 8, %v2695_v23 }
  0x12   : > { %v720_v13 = vunpack.c.l.bf16 %v632_v12  ;;  %v714_v24 = vunpack.c.0.s8 %v713_v22  ;;  %v2716_v38 = vld [vmem:[%s568_s30] sm:$0xf]  ;;  %vm583_vm6 = vcmp.eq.s32.totalorder %v2695_v23, %v2743_v55 }
  0x13   : > { %2301 = vmatpush3.bf16.msra.mxu0 %v2480_v2  ;;  %v2750_v58 = vsel %vm583_vm6, 1.0, %v2563_v1  ;;  %vm585_vm7 = vcmp.eq.s32.totalorder %v580_v56, %v2743_v55  ;;  %vm584_vm8 = vcmp.eq.s32.totalorder %v579_v57, %v2743_v55 }
  0x14   : > { %723 = vperm.xlu1 %2477, %v720_v13   ;;  %v717_v25 = vsub.s32 %v714_v24, %v2695_v23  ;;  %v1047_v59 = vsub.f32 1.0, %v2750_v58  ;;  %v2756_v60 = vsel %vm585_vm7, 1.0, %v2563_v1  ;;  %v2759_v62 = vsel %vm584_vm8, 1.0, %v2563_v1 }
  0x15   : > { %v1049_v0 = vsub.f32 1.0, %v2756_v60 }
  0x16   : > { %2303 = vmatmul.mubr.msk.bf16.vlgmr.msra.gmra.mxu0 %vm651_vm1, %v630_v3 }
  0x18   : > { %709 = vperm.xlu1 %2477, %v632_v12  }
  0x8f   : > { %v724_v19 = vpop.permute.xlu1 %723 }
  0x93   : > { %v710_v26 = vpop.permute.xlu1 %709 }
  0x94   : > { %v718_v27 = vrot.slane %v710_v26, %v717_v25 }
  0x96   : > { %v719_v28 = vmul.bf16 %v718_v27, %v630_v3  ;;  %v1048_v3 = vsub.f32 1.0, %v2759_v62 }
  0x98   : > { %2432 = vmatprep.subr.msk.bf16.mxu1 %vm751_vm3, %v719_v28  ;;  %v753_v29 = vsel %vm751_vm3, %v719_v28, 0 }
  0x99   : > { %2307 = vmatpush3.bf16.msra.mxu1 %v753_v29 }
  0x9a   : > { %2312 = vmatprep.subr.bf16.mxu1 %v2563_v1 }
  0xd6   : > { %v689_v5 = vpop.f32.mrf.mxu0 }
  0xd7   : > { %v690_v6 = vadd.f32 %v2193_v4, %v689_v5 }
  0xd8   : > { %v2304_v7 = vpop.f32.mrf.mxu0 }
  0xd9   : > { %v696_v8 = vsel %vm695_vm2, %v690_v6, -inf }
  0xda   : > { %697 = vmax.xlane.f32.xlu0 %v696_v8  ;;  %v692_v9 = vpop.f32.mrf.mxu0 }
  0xdc   : > { %v2305_v10 = vpop.f32.mrf.mxu0 }
 0x163   : > { %v698_v14 = vpop.xlane.xlu0 %697 }
 0x164   : > { %v699_v15 = vsub.f32 %v690_v6, %v698_v14  ;;  %v2782_v14 = vld [vmem:[%s3049_s7 + $0x8] sm:$0xff]  }
 0x166   : > { %v700_v16 = vmul.f32 1.442695, %v699_v15 }
 0x168   : > { %2495 = vpow2.f32 %v700_v16 }
 0x175   : > { %v2496_v17 = vpop.eup %2495 }
 0x176   : > { %v702_v18 = vsel %vm695_vm2, %v2496_v17, 0.0 }
 0x177   : > { %703 = vadd.xlane.f32.xlu0 %v702_v18 }
 0x200   : > { %v704_v30 = vpop.xlane.xlu0 %703 }
 0x201   : > { %2497 = vrcp.f32 %v704_v30 }
 0x20e   : > { %v2498_v31 = vpop.eup %2497 }
 0x20f   : > { %v706_v32 = vmul.f32 %v2498_v31, %v2496_v17 }
 0x211   : > { %v2701_v33 = vmul.f32 %v724_v19, %v706_v32 }
 0x213   : > { %v727_v34 = vpack.c.bf16 %v2701_v33, %v2701_v33 }
 0x215   : > { %728 = vxpose.xlu0.c.b16.start.end [1/1] (short) (narrow) %v727_v34, 32  ;;  %v807_v37 = vsel %vm751_vm3, %v727_v34, 0 }
 0x277   : > { %v736_v35 = vpop.trf.xlu0 }
 0x278   : > { %2308 = vmatprep.mubr.msk.bf16.mxu1 %vm744_vm4, %v736_v35  ;;  %2320 = vmatprep.mubr.msk.bf16.mxu0 %vm744_vm4, %v736_v35 }
 0x27b   : > { %v737_v36 = vpop.trf.xlu0 }
 0x27c   : > { %2309 = vmatmul.mubr.msk.bf16.vlgmr.msra.gmra.mxu1 %vm744_vm4, %v737_v36 }
 0x27d   : > { %2313 = vmatpush3.bf16.msra.mxu1 %v807_v37  ;;  %2314 = vmatprep.mubr.msk.bf16.mxu1 %vm2564_vm0, %v2563_v1 }
 0x27e   : > { %2434 = vmatprep.subr.msk.bf16.mxu1 %vm751_vm3, %v727_v34 }
 0x284   : > { %2315 = vmatmul.mubr.msk.bf16.vlgmr.msra.gmra.mxu1 %vm744_vm4, %v2716_v38 }
 0x285   : > { %2325 = vmatpush3.bf16.msra.mxu1 %v807_v37  ;;  %2326 = vmatprep.mubr.msk.bf16.mxu1 %vm744_vm4, %v736_v35 }
 0x28c   : > { %2327 = vmatmul.mubr.msk.bf16.vlgmr.msra.gmra.mxu1 %vm744_vm4, %v737_v36 }
 0x33c   : > { %v2310_v39 = vpop.f32.mrf.mxu1 }
 0x33d   : > { %v2726_v46 = vpack.c.bf16 %v2310_v39, %v2310_v39 }
 0x33e   : > { %v789_v40 = vpop.f32.mrf.mxu1 }
 0x33f   : > { %v1132_v51 = vsel %vm1130_vm5, %v2726_v46, 0 }
 0x340   : > { %v2311_v41 = vpop.f32.mrf.mxu1 }
 0x342   : > { %v792_v42 = vpop.f32.mrf.mxu1 }
 0x343   : > { %v2732_v50 = vpack.c.bf16 %v792_v42, %v789_v40 }
 0x344   : > { %v2722_v43 = vpop.f32.mrf.mxu1 }
 0x345   : > { %v849_v44 = vpack.c.bf16 %v2722_v43, %v2722_v43 }
 0x346   : > { %v2316_v45 = vpop.f32.mrf.mxu1 }
 0x347   : > { %2433 = vmatprep.subr.msk.bf16.mxu0 %vm751_vm3, %v849_v44  ;;  %v851_v47 = vsel %vm751_vm3, %v849_v44, 0 }
 0x348   : > { %v846_v48 = vpop.f32.mrf.mxu1  ;;  %2319 = vmatpush3.bf16.msra.mxu0 %v851_v47 }
 0x349   : > { %2435 = vmatprep.subr.msk.bf16.mxu0 %vm1130_vm5, %v2726_v46 }
 0x34a   : > { %v2317_v49 = vpop.f32.mrf.mxu1 }
 0x34b   : > { %2321 = vmatmul.mubr.msk.bf16.vlgmr.msra.gmra.mxu0 %vm744_vm4, %v737_v36 }
 0x34c   : > { %v2737_v52 = vpop.f32.mrf.mxu1  ;;  %2331 = vmatpush3.bf16.msra.mxu0 %v1132_v51 }
 0x34d   : > { %2332 = vmatprep.subr.bf16.mxu0 %v2732_v50 }
 0x34e   : > { %v2740_v53 = vpop.f32.mrf.mxu1 }
 0x350   : > { %v2329_v54 = vpop.f32.mrf.mxu1  ;;  %2333 = vmatpush3.bf16.msra.mxu0 %v2732_v50 }
 0x351   : > { %2346 = vmatprep.subr.bf16.mxu0 %v2782_v14 }
 0x40b   : > { %v2322_v61 = vpop.f32.mrf.mxu0 }
 0x40c   : > { %v2769_v7 = vmul.f32 %v2322_v61, %v1049_v0 }
 0x40d   : > { %v887_v63 = vpop.f32.mrf.mxu0 }
 0x40e   : > { %v2764_v2 = vmul.f32 %v1047_v59, %v887_v63  ;;  %v1059_v12 = vsel %vm988_vm9, %v2769_v7, 0.0 }
 0x40f   : > { %v2323_v4 = vpop.f32.mrf.mxu0 }
 0x410   : > { %v1053_v5 = vsel %vm695_vm2, %v2764_v2, 0.0 }
 0x411   : > { %1054 = vadd.xlane.f32.xlu1 %v1053_v5  ;;  %v890_v6 = vpop.f32.mrf.mxu0 }
 0x412   : > { %v2773_v8 = vmul.f32 %v1048_v3, %v890_v6 }
 0x414   : > { %v1056_v9 = vsel %vm695_vm2, %v2773_v8, 0.0 }
 0x415   : > { %1057 = vadd.xlane.f32.xlu1 %v1056_v9  ;;  %v1062_v10 = vadd.f32 %v1056_v9, %v1053_v5 }
 0x417   : > { %v1063_v13 = vadd.f32 %v1062_v10, %v1059_v12 }
 0x419   : > { %1060 = vadd.xlane.f32.xlu1 %v1059_v12  ;;  %v1064_v15 = vrot.slane %v1063_v13, 4 }
 0x41b   : > { %v1065_v16 = vadd.f32 %v1064_v15, %v1063_v13 }
 0x41d   : > { %v1066_v17 = vrot.slane %v1065_v16, 2 }
 0x41f   : > { %v1067_v18 = vadd.f32 %v1066_v17, %v1065_v16  ;;  %v2482_v17 = vld [vmem:[%s3049_s7] sm:$0xff]  }
 0x421   : > { %v1068_v19 = vrot.slane %v1067_v18, 1 }
 0x423   : > { %v1069_v20 = vadd.f32 %v1068_v19, %v1067_v18 }
 0x425   : > { %2499 = vrsqrt.f32 %v1069_v20  ;;  %vm1106_vm10 = vcmp.eq.f32.partialorder %v1069_v20, inf  ;;  %v1109_v29 = vand.u32 2147483648, %v1069_v20  ;;  %vm1108_vm12 = vcmp.eq.f32.partialorder %v1069_v20, 0.0 }
 0x432   : > { %v2500_v23 = vpop.eup %2499 }
 0x433   : > { %v1105_v25 = vmul.f32 %v2500_v23, %v1069_v20 }
 0x435   : > { %v1107_v27 = vsel %vm1106_vm10, %v1069_v20, %v1105_v25  ;;  %vm1103_vm10 = vcmp.gt.f32.partialorder %v1069_v20, 0.0  ;;  %v2485_v25 = vld [vmem:[%s3050_s8 + $0x8] sm:$0xff]  }
 0x436   : > { %v1110_v32 = vsel %vm1108_vm12, %v1109_v29, %v1107_v27  ;;  %v2828_v27 = vpop.f32.mrf.mxu1  ;;  %vm1408_vm12 = vcmask 76800  }
 0x437   : > { %v1111_v40 = vadd.f32 1e-15, %v1110_v32 }
 0x49a   : > { %v1055_v21 = vpop.xlane.xlu1 %1054 }
 0x49b   : > { %2501 = vrsqrt.f32 %v1055_v21  ;;  %vm1075_vm11 = vcmp.eq.f32.partialorder %v1055_v21, inf  ;;  %v1078_v30 = vand.u32 2147483648, %v1055_v21  ;;  %vm1077_vm13 = vcmp.eq.f32.partialorder %v1055_v21, 0.0 }
 0x49c   : > { %vm1070_vm7 = vcmp.gt.f32.partialorder %v1055_v21, 0.0 }
 0x49e   : > { %v1058_v22 = vpop.xlane.xlu1 %1057 }
 0x49f   : > { %2503 = vrsqrt.f32 %v1058_v22  ;;  %vm1082_vm14 = vcmp.eq.f32.partialorder %v1058_v22, inf  ;;  %v1085_v39 = vand.u32 2147483648, %v1058_v22  ;;  %vm1084_vm15 = vcmp.eq.f32.partialorder %v1058_v22, 0.0 }
 0x4a0   : > { %vm1071_vm8 = vcmp.gt.f32.partialorder %v1058_v22, 0.0 }
 0x4a2   : > { %v1061_v24 = vpop.xlane.xlu1 %1060 }
 0x4a3   : > { %2505 = vrsqrt.f32 %v1061_v24  ;;  %vm1089_vm3 = vcmp.eq.f32.partialorder %v1061_v24, inf  ;;  %v1092_v48 = vand.u32 2147483648, %v1061_v24  ;;  %vm1091_vm6 = vcmp.eq.f32.partialorder %v1061_v24, 0.0 }
 0x4a8   : > { %v2502_v26 = vpop.eup %2501 }
 0x4a9   : > { %v1074_v28 = vmul.f32 %v2502_v26, %v1055_v21  ;;  %v2486_v26 = vld [vmem:[%s3050_s8] sm:$0xff]  }
 0x4ab   : > { %v1076_v31 = vsel %vm1075_vm11, %v1055_v21, %v1074_v28  ;;  %vm1072_vm11 = vcmp.gt.f32.partialorder %v1061_v24, 0.0  ;;  %v2206_v28 = vld [vmem:[%s3048_s6] ss:$0 sm:$0xff] }
 0x4ac   : > { %v2504_v34 = vpop.eup %2503  ;;  %v1079_v35 = vsel %vm1077_vm13, %v1078_v30, %v1076_v31  ;;  %vm1401_vm13 = vcmask 80896  }
 0x4ad   : > { %v1094_v36 = vadd.f32 1e-15, %v1079_v35  ;;  %v1081_v37 = vmul.f32 %v2504_v34, %v1058_v22 }
 0x4af   : > { %2507 = vrcp.f32 %v1094_v36  ;;  %v1083_v41 = vsel %vm1082_vm14, %v1058_v22, %v1081_v37 }
 0x4b0   : > { %v2506_v42 = vpop.eup %2505  ;;  %v1086_v44 = vsel %vm1084_vm15, %v1085_v39, %v1083_v41  ;;  %2509 = vrcp.f32 %v1111_v40 }
 0x4b1   : > { %v1095_v45 = vadd.f32 1e-15, %v1086_v44  ;;  %v1088_v47 = vmul.f32 %v2506_v42, %v1061_v24 }
 0x4b3   : > { %2511 = vrcp.f32 %v1095_v45  ;;  %v1090_v49 = vsel %vm1089_vm3, %v1061_v24, %v1088_v47 }
 0x4b4   : > { %v1093_v51 = vsel %vm1091_vm6, %v1092_v48, %v1090_v49 }
 0x4b5   : > { %v1096_v54 = vadd.f32 1e-15, %v1093_v51  ;;  %v2215_v51 = vld [vmem:[%s3051_s9] ss:$0 sm:$0xff] }
 0x4b7   : > { %2513 = vrcp.f32 %v1096_v54 }
 0x4bc   : > { %v2508_v56 = vpop.eup %2507 }
 0x4bd   : > { %v1100_v57 = vsel %vm1070_vm7, %v2508_v56, 0.0  ;;  %v2510_v61 = vpop.eup %2509 }
 0x4be   : > { %v1114_v0 = vmul.f32 %v1100_v57, %v2764_v2  ;;  %v1113_v6 = vsel %vm1103_vm10, %v2510_v61, 0.0 }
 0x4c0   : > { %v2512_v63 = vpop.eup %2511  ;;  %v2787_v10 = vmul.f32 %v1114_v0, %v1113_v6 }
 0x4c1   : > { %v1101_v4 = vsel %vm1071_vm8, %v2512_v63, 0.0 }
 0x4c2   : > { %v1115_v5 = vmul.f32 %v1101_v4, %v2773_v8 }
 0x4c4   : > { %v2514_v9 = vpop.eup %2513  ;;  %v2789_v12 = vmul.f32 %v1115_v5, %v1113_v6 }
 0x4c5   : > { %v1102_v13 = vsel %vm1072_vm11, %v2514_v9, 0.0 }
 0x4c6   : > { %v1120_v15 = vpack.c.bf16 %v2789_v12, %v2787_v10  ;;  %v1116_v16 = vmul.f32 %v1102_v13, %v2769_v7  ;;  %v2483_v7 = vld [vmem:[%s3047_s5 + $0x8] sm:$0xff]  }
 0x4c7   : > { %2338 = vmatprep.subr.bf16.mxu1 %v2483_v7 }
 0x4c8   : > { %2334 = vmatprep.mubr.msk.bf16.mxu0 %vm695_vm2, %v1120_v15  ;;  %v2795_v2 = vmul.f32 %v1116_v16, %v1113_v6  ;;  %2339 = vmatpush3.bf16.msra.mxu1 %v2483_v7 }
 0x4ca   : > { %v2799_v8 = vpack.c.bf16 %v2795_v2, %v2795_v2 }
 0x4cc   : > { %2335 = vmatmul.mubr.msk.bf16.vlgmr.msra.gmra.mxu0 %vm695_vm2, %v2799_v8 }
 0x4cd   : > { %2347 = vmatpush3.bf16.msra.mxu0 %v2782_v14  ;;  %2350 = vmatprep.mubr.msk.bf16.mxu0 %vm651_vm1, %v2732_v50  ;;  %v2484_v50 = vld [vmem:[%s3047_s5] sm:$0xff]  }
 0x4ce   : > { %2348 = vmatprep.subr.bf16.mxu0 %v2482_v17  ;;  %2340 = vmatprep.subr.bf16.mxu1 %v2484_v50 }
 0x4cf   : > { %2341 = vmatpush3.bf16.msra.mxu1 %v2484_v50 }
 0x4d0   : > { %2354 = vmatprep.subr.bf16.mxu1 %v2485_v25 }
 0x4d1   : > { %2349 = vmatpush3.bf16.msra.mxu0 %v2482_v17 }
 0x4d2   : > { %2362 = vmatprep.subr.bf16.mxu0 %v2563_v1 }
 0x4d4   : > { %2351 = vmatmul.mubr.msk.bf16.vlgmr.msra.gmra.mxu0 %vm651_vm1, %v2726_v46 }
 0x4d5   : > { %2366 = vmatprep.mubr.msk.bf16.mxu0 %vm2564_vm0, %v2563_v1 }
 0x58c   : > { %v2336_v14 = vpop.f32.mrf.mxu0 }
 0x58d   : > { %v1183_v21 = vpack.c.bf16 %v2336_v14, %v2336_v14 }
 0x58e   : > { %v1168_v18 = vpop.f32.mrf.mxu0 }
 0x590   : > { %v2337_v19 = vpop.f32.mrf.mxu0 }
 0x592   : > { %v1171_v20 = vpop.f32.mrf.mxu0 }
 0x593   : > { %v1182_v46 = vpack.c.bf16 %v1171_v20, %v1168_v18 }
 0x594   : > { %v2352_v22 = vpop.f32.mrf.mxu0 }
 0x595   : > { %2342 = vmatprep.mubr.msk.bf16.mxu1 %vm651_vm1, %v1182_v46 }
 0x596   : > { %2343 = vmatmul.mubr.msk.bf16.vlgmr.msra.gmra.mxu1 %vm651_vm1, %v1183_v21  ;;  %v1307_v23 = vpop.f32.mrf.mxu0 }
 0x597   : > { %2355 = vmatpush3.bf16.msra.mxu1 %v2485_v25 }
 0x598   : > { %v2353_v24 = vpop.f32.mrf.mxu0  ;;  %2356 = vmatprep.subr.bf16.mxu1 %v2486_v26 }
 0x599   : > { %v912_v24 = vunpack.c.l.bf16 %v2716_v38 }
 0x59a   : > { %v1310_v42 = vpop.f32.mrf.mxu0 }
 0x59b   : > { %2357 = vmatpush3.bf16.msra.mxu1 %v2486_v26  ;;  %v913_v26 = vsel %vm744_vm4, %v912_v24, 0.0  ;;  %vm1803_vm4 = vcmask 1044480  }
 0x656   : > { %v2344_v29 = vpop.f32.mrf.mxu1 }
 0x657   : > { %v1251_v30 = vadd.f32 %v2344_v29, %v2206_v28 }
 0x658   : > { %v1242_v31 = vpop.f32.mrf.mxu1 }
 0x659   : > { %v1323_v32 = vadd.f32 %v2352_v22, %v1251_v30  ;;  %v1243_v34 = vadd.f32 %v2206_v28, %v1242_v31 }
 0x65a   : > { %v2345_v35 = vpop.f32.mrf.mxu1 }
 0x65b   : > { %v1326_v36 = vmax.f32 %v1323_v32, 0.0  ;;  %v1321_v40 = vadd.f32 %v1307_v23, %v1243_v34 }
 0x65c   : > { %v1245_v37 = vpop.f32.mrf.mxu1 }
 0x65d   : > { %v1328_v39 = vpack.c.bf16 %v1326_v36, %v1326_v36  ;;  %v1246_v41 = vadd.f32 %v2206_v28, %v1245_v37  ;;  %v1324_v47 = vmax.f32 %v1321_v40, 0.0 }
 0x65f   : > { %v1322_v44 = vadd.f32 %v1310_v42, %v1246_v41  ;;  %v1457_v45 = vsel %vm1130_vm5, %v1328_v39, 0 }
 0x660   : > { %2363 = vmatpush3.bf16.msra.mxu0 %v1457_v45 }
 0x661   : > { %v1325_v48 = vmax.f32 %v1322_v44, 0.0  ;;  %2364 = vmatprep.subr.bf16.mxu0 %v2563_v1 }
 0x663   : > { %v1327_v49 = vpack.c.bf16 %v1325_v48, %v1324_v47 }
 0x665   : > { %2358 = vmatprep.mubr.msk.bf16.mxu1 %vm651_vm1, %v1327_v49  ;;  %2365 = vmatpush3.bf16.msra.mxu0 %v1327_v49 }
 0x666   : > { %2359 = vmatmul.mubr.msk.bf16.vlgmr.msra.gmra.mxu1 %vm651_vm1, %v1328_v39  ;;  %2378 = vmatprep.subr.bf16.mxu0 %v2563_v1 }
 0x667   : > { %2374 = vmatprep.mubr.msk.bf16.mxu1 %vm695_vm2, %v1120_v15 }
 0x726   : > { %v2360_v54 = vpop.f32.mrf.mxu1 }
 0x727   : > { %v1396_v56 = vadd.f32 %v2360_v54, %v2215_v51 }
 0x728   : > { %v1387_v57 = vpop.f32.mrf.mxu1 }
 0x729   : > { %v1388_v61 = vadd.f32 %v2215_v51, %v1387_v57  ;;  %v1409_v63 = vsel %vm1408_vm12, %v1396_v56, -inf }
 0x72a   : > { %1410 = vmax.xlane.f32.xlu1 %v1409_v63  ;;  %v2361_v0 = vpop.f32.mrf.mxu1 }
 0x72b   : > { %v1402_v4 = vsel %vm1401_vm13, %v1388_v61, -inf }
 0x72c   : > { %v1390_v5 = vpop.f32.mrf.mxu1  ;;  %1403 = vmax.xlane.f32.xlu0 %v1402_v4 }
 0x72d   : > { %v1391_v6 = vadd.f32 %v2215_v51, %v1390_v5 }
 0x72f   : > { %v1405_v9 = vsel %vm1401_vm13, %v1391_v6, -inf }
 0x730   : > { %1406 = vmax.xlane.f32.xlu1 %v1405_v9 }
 0x7b3   : > { %v1411_v13 = vpop.xlane.xlu1 %1410 }
 0x7b4   : > { %v1414_v15 = vsub.f32 %v1396_v56, %v1411_v13 }
 0x7b5   : > { %v1404_v16 = vpop.xlane.xlu0 %1403 }
 0x7b6   : > { %v1419_v17 = vmul.f32 1.442695, %v1414_v15  ;;  %v1412_v7 = vsub.f32 %v1388_v61, %v1404_v16 }
 0x7b8   : > { %2515 = vpow2.f32 %v1419_v17  ;;  %v1415_v50 = vmul.f32 1.442695, %v1412_v7 }
 0x7b9   : > { %v1407_v14 = vpop.xlane.xlu1 %1406 }
 0x7ba   : > { %2517 = vpow2.f32 %v1415_v50  ;;  %v1413_v18 = vsub.f32 %v1391_v6, %v1407_v14 }
 0x7bc   : > { %v1417_v19 = vmul.f32 1.442695, %v1413_v18 }
 0x7be   : > { %2519 = vpow2.f32 %v1417_v19 }
 0x7c5   : > { %v2516_v20 = vpop.eup %2515 }
 0x7c6   : > { %v1427_v46 = vsel %vm1408_vm12, %v2516_v20, 0.0 }
 0x7c7   : > { %v2518_v21 = vpop.eup %2517  ;;  %1428 = vadd.xlane.f32.xlu1 %v1427_v46 }
 0x7c8   : > { %v1421_v22 = vsel %vm1401_vm13, %v2518_v21, 0.0 }
 0x7cb   : > { %v2520_v23 = vpop.eup %2519  ;;  %1422 = vadd.xlane.f32.xlu1 %v1421_v22 }
 0x7cc   : > { %v1424_v25 = vsel %vm1401_vm13, %v2520_v23, 0.0 }
 0x7cf   : > { %1425 = vadd.xlane.f32.xlu1 %v1424_v25 }
 0x7d3   : > { %914 = vadd.xlane.f32.xlu1 %v913_v26 }
 0x850   : > { %v1429_v28 = vpop.xlane.xlu1 %1428 }
 0x851   : > { %2521 = vrcp.f32 %v1429_v28 }
 0x854   : > { %v1423_v29 = vpop.xlane.xlu1 %1422 }
 0x855   : > { %2523 = vrcp.f32 %v1423_v29 }
 0x858   : > { %v1426_v30 = vpop.xlane.xlu1 %1425 }
 0x859   : > { %2525 = vrcp.f32 %v1426_v30  ;;  %v901_v30 = vmul.f32 %v2722_v43, %v2701_v33  ;;  %v984_v43 = vmul.f32 %v2737_v52, %v2737_v52 }
 0x85c   : > { %v915_v25 = vpop.xlane.xlu1 %914 }
 0x85e   : > { %v2522_v31 = vpop.eup %2521 }
 0x85f   : > { %v2850_v32 = vmul.f32 %v2522_v31, %v2516_v20  ;;  %v983_v31 = vmul.f32 %v2828_v27, %v2828_v27 }
 0x861   : > { %v1437_v34 = vpack.c.bf16 %v2850_v32, %v2850_v32 }
 0x862   : > { %v2524_v35 = vpop.eup %2523 }
 0x863   : > { %2436 = vmatprep.subr.msk.bf16.mxu1 %vm1130_vm5, %v1437_v34  ;;  %v1501_v38 = vsel %vm1130_vm5, %v1437_v34, 0  ;;  %v2856_v37 = vmul.f32 %v2524_v35, %v2518_v21  ;;  %v982_v35 = vmul.f32 %v2740_v53, %v2740_v53 }
 0x864   : > { %2371 = vmatpush3.bf16.msra.mxu1 %v1501_v38 }
 0x866   : > { %v2526_v36 = vpop.eup %2525 }
 0x867   : > { %v2858_v39 = vmul.f32 %v2526_v36, %v2520_v23  ;;  %v902_v36 = vsel %vm695_vm2, %v901_v30, 0.0 }
 0x869   : > { %v1436_v40 = vpack.c.bf16 %v2858_v39, %v2856_v37 }
 0x86b   : > { %1438 = vxpose.xlu0.c.b16.start [1/2] (short) (narrow) %v1436_v40, 16  ;;  %2372 = vmatprep.subr.bf16.mxu1 %v1436_v40 }
 0x86c   : > { %2373 = vmatpush3.bf16.msra.mxu1 %v1436_v40 }
 0x86d   : > { %2386 = vmatprep.subr.bf16.mxu1 %v2563_v1 }
 0x86f   : > { %1439 = vxpose.xlu0.c.b16.end [2/2] (short) (narrow) %v1437_v34, 16  ;;  %2375 = vmatmul.mubr.msk.bf16.vlgmr.msra.gmra.mxu1 %vm695_vm2, %v2799_v8 }
 0x870   : > { %2387 = vmatpush3.bf16.msra.mxu1 %v1501_v38  ;;  %2390 = vmatprep.mubr.msk.bf16.mxu1 %vm2564_vm0, %v2563_v1 }
 0x871   : > { %2388 = vmatprep.subr.bf16.mxu1 %v2563_v1 }
 0x874   : > { %2389 = vmatpush3.bf16.msra.mxu1 %v1436_v40 }
 0x875   : > { %2400 = vmatprep.subr.bf16.mxu1 %v2563_v1 }
 0x878   : > { %2478 = vset.pattern.permute.xlu0 %v2565_v11 }
 0x8cd   : > { %v1446_v41 = vpop.trf.xlu0 }
 0x8ce   : > { %2391 = vmatmul.mubr.msk.bf16.vlgmr.msra.gmra.mxu1 %vm695_vm2, %v1446_v41  ;;  %2367 = vmatmul.mubr.msk.bf16.vlgmr.msra.gmra.mxu0 %vm695_vm2, %v1446_v41 }
 0x8cf   : > { %2382 = vmatprep.mubr.msk.bf16.mxu0 %vm2564_vm0, %v2563_v1  ;;  %2404 = vmatprep.mubr.msk.bf16.mxu1 %vm2564_vm0, %v2563_v1 }
 0x92f   : > { %v2376_v8 = vpop.f32.mrf.mxu1 }
 0x930   : > { %v1552_v42 = vpack.c.bf16 %v2376_v8, %v2376_v8  ;;  %v1599_v49 = vmul.f32 %v2376_v8, %v2850_v32 }
 0x931   : > { %v1537_v44 = vpop.f32.mrf.mxu1 }
 0x932   : > { %v1554_v45 = vsel %vm1130_vm5, %v1552_v42, 0  ;;  %v1597_v11 = vmul.f32 %v1537_v44, %v2856_v37  ;;  %v1603_v63 = vsel %vm1408_vm12, %v1599_v49, 0.0  ;;  %vm1693_vm5 = vcmask 74752  }
 0x933   : > { %v2377_v47 = vpop.f32.mrf.mxu1  ;;  %2379 = vmatpush3.bf16.msra.mxu0 %v1554_v45 }
 0x934   : > { %2380 = vmatprep.subr.bf16.mxu0 %v2563_v1  ;;  %v1600_v56 = vsel %vm1401_vm13, %v1597_v11, 0.0  ;;  %v1614_v47 = vsel %vm695_vm2, %v2787_v10, 0.0  ;;  %v1620_v11 = vsel %vm988_vm9, %v2795_v2, 0.0 }
 0x935   : > { %v1540_v48 = vpop.f32.mrf.mxu1 }
 0x936   : > { %v1551_v51 = vpack.c.bf16 %v1540_v48, %v1537_v44  ;;  %v1598_v54 = vmul.f32 %v1540_v48, %v2858_v39  ;;  %v989_v44 = vsel %vm988_vm9, %v984_v43, 0.0 }
 0x938   : > { %v1601_v57 = vsel %vm1401_vm13, %v1598_v54, 0.0  ;;  %2381 = vmatpush3.bf16.msra.mxu0 %v1551_v51 }
 0x939   : > { %2394 = vmatprep.subr.bf16.mxu0 %v2563_v1  ;;  %v1602_v61 = vadd.f32 %v1601_v57, %v1600_v56 }
 0x93b   : > { %2383 = vmatmul.mubr.msk.bf16.vlgmr.msra.gmra.mxu0 %vm695_vm2, %v1446_v41  ;;  %v2886_v0 = vadd.f32 %v1603_v63, %v1602_v61  ;;  %v985_v41 = vsel %vm695_vm2, %v982_v35, 0.0 }
 0x93c   : > { %2396 = vmatprep.mubr.msk.bf16.mxu0 %vm2564_vm0, %v2563_v1 }
 0x98e   : > { %v2890_v4 = vpop.f32.mrf.mxu1  ;;  %v1493_v5 = vpop.f32.mrf.mxu0 }
 0x98f   : > { %v1690_v6 = vmul.f32 %v2890_v4, %v2890_v4 }
 0x990   : > { %v2392_v9 = vpop.f32.mrf.mxu1  ;;  %v2368_v13 = vpop.f32.mrf.mxu0 }
 0x991   : > { %v1692_v50 = vsel %vm1401_vm13, %v1690_v6, 0.0 }
 0x992   : > { %v2894_v15 = vpop.f32.mrf.mxu1  ;;  %v1496_v16 = vpop.f32.mrf.mxu0 }
 0x993   : > { %v1691_v17 = vmul.f32 %v2894_v15, %v2894_v15  ;;  %v2898_v7 = vpack.c.bf16 %v1496_v16, %v1493_v5 }
 0x994   : > { %v2369_v14 = vpop.f32.mrf.mxu0  ;;  %v2393_v18 = vpop.f32.mrf.mxu1 }
 0x995   : > { %v1805_v19 = vsel %vm1803_vm4, %v2898_v7, 0  ;;  %v1694_v20 = vsel %vm1693_vm5, %v1691_v17, 0.0 }
 0x996   : > { %v1695_v46 = vadd.f32 %v1694_v20, %v1692_v50  ;;  %2395 = vmatpush3.bf16.msra.mxu0 %v1805_v19 }
 0x997   : > { %2408 = vmatprep.subr.bf16.mxu0 %v2563_v1 }
 0x998   : > { %1696 = vadd.xlane.f32.xlu0 %v1695_v46 }
 0x9fb   : > { %v1590_v21 = vpop.f32.mrf.mxu0 }
 0x9fc   : > { %v2906_v22 = vmul.f32 %v1590_v21, %v1047_v59  ;;  %v916_v59 = vmul.f32 %v915_v25, %v2701_v33 }
 0x9fd   : > { %v2384_v23 = vpop.f32.mrf.mxu0 }
 0x9fe   : > { %v1748_v24 = vsel %vm1401_vm13, %v2906_v22, 0.0  ;;  %v917_v40 = vmul.f32 %v916_v59, %v2701_v33  ;;  %v1617_v33 = vsel %vm695_vm2, %v2789_v12, 0.0 }
 0x9ff   : > { %1749 = vadd.xlane.f32.xlu1 %v1748_v24  ;;  %v1593_v26 = vpop.f32.mrf.mxu0 }
 0xa00   : > { %v2912_v28 = vmul.f32 %v1593_v26, %v1048_v3  ;;  %v986_v3 = vsel %vm695_vm2, %v983_v31, 0.0  ;;  %v918_v42 = vsel %vm695_vm2, %v917_v40, 0.0 }
 0xa01   : > { %v2385_v29 = vpop.f32.mrf.mxu0  ;;  %v987_v8 = vadd.f32 %v986_v3, %v985_v41 }
 0xa02   : > { %v1751_v34 = vsel %vm1693_vm5, %v2912_v28, 0.0 }
 0xa03   : > { %1752 = vadd.xlane.f32.xlu1 %v1751_v34  ;;  %v1754_v38 = vadd.f32 %v1751_v34, %v1748_v24  ;;  %v990_v45 = vadd.f32 %v989_v44, %v987_v8 }
 0xa05   : > { %v1755_v48 = vrot.slane %v1754_v38, 4 }
 0xa07   : > { %903 = vadd.xlane.f32.xlu1 %v902_v36  ;;  %v1756_v49 = vadd.f32 %v1755_v48, %v1754_v38 }
 0xa09   : > { %v1757_v51 = vrot.slane %v1756_v49, 2 }
 0xa0b   : > { %919 = vadd.xlane.f32.xlu1 %v918_v42  ;;  %v1758_v54 = vadd.f32 %v1757_v51, %v1756_v49 }
 0xa0d   : > { %v1759_v56 = vrot.slane %v1758_v54, 1 }
 0xa0f   : > { %991 = vadd.xlane.f32.xlu1 %v990_v45  ;;  %v1760_v57 = vadd.f32 %v1759_v56, %v1758_v54  ;;  %v2487_v54 = vld [vmem:[%s3054_s12 + $0x8] sm:$0xff]  }
 0xa11   : > { %2527 = vrsqrt.f32 %v1760_v57  ;;  %vm1786_vm14 = vcmp.eq.f32.partialorder %v1760_v57, inf  ;;  %v1789_v14 = vand.u32 2147483648, %v1760_v57  ;;  %vm1788_vm15 = vcmp.eq.f32.partialorder %v1760_v57, 0.0 }
 0xa12   : > { %vm1783_vm4 = vcmp.gt.f32.partialorder %v1760_v57, 0.0 }
 0xa13   : > { %1615 = vadd.xlane.f32.xlu1 %v1614_v47 }
 0xa17   : > { %1618 = vadd.xlane.f32.xlu1 %v1617_v33 }
 0xa1b   : > { %1621 = vadd.xlane.f32.xlu1 %v1620_v11 }
 0xa1e   : > { %v2528_v10 = vpop.eup %2527 }
 0xa1f   : > { %v1785_v6 = vmul.f32 %v2528_v10, %v1760_v57 }
 0xa21   : > { %v1787_v17 = vsel %vm1786_vm14, %v1760_v57, %v1785_v6 }
 0xa22   : > { %v1790_v21 = vsel %vm1788_vm15, %v1789_v14, %v1787_v17 }
 0xa23   : > { %v1791_v35 = vadd.f32 1e-15, %v1790_v21  ;;  %v1017_v21 = vmul.f32 0.2236068, %v2756_v60 }
 0xa88   : > { %v1750_v61 = vpop.xlane.xlu1 %1749 }
 0xa89   : > { %2529 = vrsqrt.f32 %v1750_v61  ;;  %vm1765_vm3 = vcmp.eq.f32.partialorder %v1750_v61, inf  ;;  %v1768_v46 = vand.u32 2147483648, %v1750_v61  ;;  %vm1767_vm6 = vcmp.eq.f32.partialorder %v1750_v61, 0.0 }
 0xa8a   : > { %vm1761_vm10 = vcmp.gt.f32.partialorder %v1750_v61, 0.0 }
 0xa8c   : > { %v1753_v63 = vpop.xlane.xlu1 %1752 }
 0xa8d   : > { %2531 = vrsqrt.f32 %v1753_v63  ;;  %vm1772_vm7 = vcmp.eq.f32.partialorder %v1753_v63, inf  ;;  %v1775_v34 = vand.u32 2147483648, %v1753_v63  ;;  %vm1774_vm8 = vcmp.eq.f32.partialorder %v1753_v63, 0.0 }
 0xa8e   : > { %vm1762_vm11 = vcmp.gt.f32.partialorder %v1753_v63, 0.0 }
 0xa90   : > { %v904_v5 = vpop.xlane.xlu1 %903 }
 0xa91   : > { %v905_v12 = vrot.slane %v904_v5, 4 }
 0xa93   : > { %v906_v9 = vadd.f32 %v905_v12, %v904_v5 }
 0xa94   : > { %v920_v13 = vpop.xlane.xlu1 %919 }
 0xa95   : > { %v907_v2 = vrot.slane %v906_v9, 2  ;;  %v921_v16 = vrot.slane %v920_v13, 4 }
 0xa96   : > { %v2530_v50 = vpop.eup %2529 }
 0xa97   : > { %v1764_v18 = vmul.f32 %v2530_v50, %v1750_v61  ;;  %v922_v19 = vadd.f32 %v921_v16, %v920_v13  ;;  %v908_v20 = vadd.f32 %v907_v2, %v906_v9  ;;  %v2490_v13 = vld [vmem:[%s3052_s10] sm:$0xff]  }
 0xa99   : > { %v1766_v23 = vsel %vm1765_vm3, %v1750_v61, %v1764_v18  ;;  %v923_v24 = vrot.slane %v922_v19, 2  ;;  %v909_v25 = vrot.slane %v908_v20, 1  ;;  %v2488_v61 = vld [vmem:[%s3054_s12] sm:$0xff]  }
 0xa9a   : > { %v2532_v26 = vpop.eup %2531  ;;  %v1769_v29 = vsel %vm1767_vm6, %v1768_v46, %v1766_v23  ;;  %v1015_v23 = vmul.f32 0.2236068, %v2750_v58 }
 0xa9b   : > { %v1777_v30 = vadd.f32 1e-15, %v1769_v29  ;;  %v1771_v31 = vmul.f32 %v2532_v26, %v1753_v63  ;;  %v910_v59 = vadd.f32 %v909_v25, %v908_v20  ;;  %v924_v38 = vadd.f32 %v923_v24, %v922_v19 }
 0xa9c   : > { %v1016_v24 = vmul.f32 0.2236068, %v2759_v62 }
 0xa9d   : > { %2533 = vrcp.f32 %v1777_v30  ;;  %v1773_v3 = vsel %vm1772_vm7, %v1753_v63, %v1771_v31  ;;  %2437 = vpush %v910_v59  ;;  %v925_v40 = vrot.slane %v924_v38, 1 }
 0xa9e   : > { %v1776_v36 = vsel %vm1774_vm8, %v1775_v34, %v1773_v3  ;;  %2535 = vrcp.f32 %v1791_v35  ;;  %vm2105_vm8 = vcmp.eq.s32.totalorder %v2743_v55, 15 }
 0xa9f   : > { %v1778_v43 = vadd.f32 1e-15, %v1776_v36  ;;  %v926_v41 = vadd.f32 %v925_v40, %v924_v38 }
 0xaa1   : > { %2537 = vrcp.f32 %v1778_v43  ;;  %2439 = vpush %v926_v41 }
 0xaaa   : > { %v2534_v8 = vpop.eup %2533 }
 0xaab   : > { %v1781_v42 = vsel %vm1761_vm10, %v2534_v8, 0.0  ;;  %v2536_v44 = vpop.eup %2535  ;;  %vm2109_vm10 = vcmask 122880  }
 0xaac   : > { %v1794_v47 = vmul.f32 %v1781_v42, %v2906_v22  ;;  %v1793_v48 = vsel %vm1783_vm4, %v2536_v44, 0.0  ;;  %v992_v22 = vpop.xlane.xlu1 %991 }
 0xaae   : > { %v2538_v45 = vpop.eup %2537  ;;  %v1796_v49 = vmul.f32 %v1794_v47, %v1793_v48 }
 0xaaf   : > { %v1782_v33 = vsel %vm1762_vm11, %v2538_v45, 0.0 }
 0xab0   : > { %v1795_v11 = vmul.f32 %v1782_v33, %v2912_v28  ;;  %v993_v28 = vrot.slane %v992_v22, 4  ;;  %v1616_v20 = vpop.xlane.xlu1 %1615 }
 0xab1   : > { %v1623_v40 = vmul.f32 %v1616_v20, %v2856_v37 }
 0xab2   : > { %v1797_v51 = vmul.f32 %v1795_v11, %v1793_v48  ;;  %v994_v57 = vadd.f32 %v993_v28, %v992_v22 }
 0xab3   : > { %v1626_v45 = vmul.f32 %v1623_v40, %v2856_v37 }
 0xab4   : > { %v1798_v56 = vpack.c.bf16 %v1797_v51, %v1796_v49  ;;  %v995_v10 = vrot.slane %v994_v57, 2  ;;  %v1619_v46 = vpop.xlane.xlu1 %1618 }
 0xab5   : > { %v1624_v35 = vmul.f32 %v1619_v46, %v2858_v39 }
 0xab6   : > { %2397 = vmatmul.mubr.msk.bf16.vlgmr.msra.gmra.mxu0 %vm1401_vm13, %v1798_v56  ;;  %v996_v5 = vadd.f32 %v995_v10, %v994_v57  ;;  %v2491_v57 = vld [vmem:[%s3055_s13 + $0x8] sm:$0xff]  }
 0xab7   : > { %2409 = vmatpush3.bf16.msra.mxu0 %v2487_v54  ;;  %2412 = vmatprep.mubr.msk.bf16.mxu0 %vm2564_vm0, %v2563_v1  ;;  %v1629_v54 = vsel %vm1401_vm13, %v1626_v45, 0.0 }
 0xab8   : > { %2410 = vmatprep.subr.bf16.mxu0 %v2563_v1  ;;  %v997_v6 = vrot.slane %v996_v5, 1  ;;  %v1622_v38 = vpop.xlane.xlu1 %1621 }
 0xab9   : > { %v1625_v43 = vmul.f32 %v1622_v38, %v2850_v32 }
 0xaba   : > { %v998_v9 = vadd.f32 %v997_v6, %v996_v5 }
 0xabb   : > { %2411 = vmatpush3.bf16.msra.mxu0 %v2488_v61  ;;  %v1628_v47 = vmul.f32 %v1625_v43, %v2850_v32 }
 0xabc   : > { %2424 = vmatprep.subr.bf16.mxu0 %v2563_v1 }
 0xabd   : > { %v1632_v56 = vsel %vm1408_vm12, %v1628_v47, 0.0 }
 0xabe   : > { %2413 = vmatmul.mubr.msk.bf16.vlgmr.msra.gmra.mxu0 %vm651_vm1, %v2898_v7  ;;  %v2489_v7 = vld [vmem:[%s3052_s10 + $0x8] sm:$0xff]  }
 0xabf   : > { %2428 = vmatprep.mubr.msk.bf16.mxu0 %vm2564_vm0, %v2563_v1  ;;  %2401 = vmatpush3.bf16.msra.mxu1 %v2489_v7 }
 0xac0   : > { %2402 = vmatprep.subr.bf16.mxu1 %v2563_v1 }
 0xac3   : > { %2403 = vmatpush3.bf16.msra.mxu1 %v2490_v13 }
 0xac4   : > { %2416 = vmatprep.subr.bf16.mxu1 %v2563_v1 }
 0xace   : > { %s2954_s23 = spop %2437 }
 0xad2   : > { %s2440_s26 = spop %2439 }
 0xad3   : > { %s928_s27 = sadd.f32 1e-15, %s2440_s26 }
 0xad5   : > { %v929_v63 = vstv %s928_s27 }
 0xad6   : > { %2539 = vrcp.f32 %v929_v63 }
 0xae3   : > { %v2540_v12 = vpop.eup %2539 }
 0xae4   : > { %2441 = vpush %v2540_v12 }
 0xae5   : > { %2443 = vpush %v998_v9 }
 0xb15   : > { %s2964_s18 = spop %2441 }
 0xb16   : > { %s2444_s19 = spop %2443  ;;  %s932_s22 = smul.f32 %s2964_s18, %s2954_s23 }
 0xb17   : > { %v1000_v2 = vstv %s2444_s19 }
 0xb18   : > { %2541 = vrsqrt.f32 %v1000_v2  ;;  %vm1003_vm14 = vcmp.eq.f32.partialorder %v1000_v2, inf  ;;  %v1006_v50 = vand.u32 2147483648, %v1000_v2  ;;  %vm1005_vm15 = vcmp.eq.f32.partialorder %v1000_v2, 0.0  ;;  %s933_s26 = ssub.f32 0.0, %s932_s22 }
 0xb25   : > { %v2542_v16 = vpop.eup %2541 }
 0xb26   : > { %v1002_v17 = vmul.f32 %v2542_v16, %v1000_v2 }
 0xb28   : > { %v1004_v14 = vsel %vm1003_vm14, %v1000_v2, %v1002_v17  ;;  %v2226_v2 = vld [vmem:[%s3053_s11] ss:$0 sm:$0xff] }
 0xb29   : > { %v1007_v18 = vsel %vm1005_vm15, %v1006_v50, %v1004_v14 }
 0xb2a   : > { %2445 = vpush %v1007_v18 }
 0xb5b   : > { %s2446_s1 = spop %2445 }
 0xb5c   : > { %s1009_s20 = sadd.f32 1e-15, %s2446_s1 }
 0xb5e   : > { %v1010_v19 = vstv %s1009_s20 }
 0xb5f   : > { %2543 = vrcp.f32 %v1010_v19 }
 0xb6c   : > { %v2544_v25 = vpop.eup %2543 }
 0xb6d   : > { %v1012_v26 = vmul.f32 %v2544_v25, %v2740_v53  ;;  %v1013_v29 = vmul.f32 %v2544_v25, %v2828_v27  ;;  %v1014_v30 = vmul.f32 %v2544_v25, %v2737_v52  ;;  %v1627_v52 = vmul.f32 %v1624_v35, %v2858_v39 }
 0xb6f   : > { %v1018_v31 = vsub.f32 %v1012_v26, %v1015_v23  ;;  %v1019_v59 = vsub.f32 %v1013_v29, %v1016_v24  ;;  %v1020_v34 = vsub.f32 %v1014_v30, %v1017_v21  ;;  %v1630_v48 = vsel %vm1401_vm13, %v1627_v52, 0.0 }
 0xb70   : > { %v1631_v39 = vadd.f32 %v1630_v48, %v1629_v54 }
 0xb71   : > { %v1021_v3 = vmul.f32 %v1018_v31, %v1018_v31  ;;  %v1022_v36 = vmul.f32 %v1019_v59, %v1019_v59  ;;  %v1023_v60 = vmul.f32 %v1020_v34, %v1020_v34 }
 0xb72   : > { %v1633_v32 = vadd.f32 %v1632_v56, %v1631_v39 }
 0xb73   : > { %v1024_v41 = vsel %vm695_vm2, %v1021_v3, 0.0  ;;  %v1025_v53 = vsel %vm695_vm2, %v1022_v36, 0.0  ;;  %v1027_v42 = vsel %vm988_vm9, %v1023_v60, 0.0 }
 0xb74   : > { %v1026_v27 = vadd.f32 %v1025_v53, %v1024_v41 }
 0xb76   : > { %v1841_v8 = vpop.f32.mrf.mxu0  ;;  %v1028_v44 = vadd.f32 %v1027_v42, %v1026_v27 }
 0xb78   : > { %v2398_v33 = vpop.f32.mrf.mxu0  ;;  %1029 = vadd.xlane.f32.xlu1 %v1028_v44 }
 0xb7a   : > { %v1844_v11 = vpop.f32.mrf.mxu0 }
 0xb7b   : > { %v1848_v49 = vpack.c.bf16 %v1844_v11, %v1841_v8 }
 0xb7c   : > { %v2399_v51 = vpop.f32.mrf.mxu0  ;;  %1605 = vadd.xlane.f32.xlu1 %v2886_v0  ;;  %v2492_v0 = vld [vmem:[%s3055_s13] sm:$0xff]  }
 0xb7d   : > { %2405 = vmatmul.mubr.msk.bf16.vlgmr.msra.gmra.mxu1 %vm651_vm1, %v1848_v49  ;;  %v1697_v51 = vpop.xlane.xlu0 %1696 }
 0xb7e   : > { %v1959_v61 = vpop.f32.mrf.mxu0  ;;  %2420 = vmatprep.mubr.msk.bf16.mxu1 %vm2564_vm0, %v2563_v1  ;;  %2417 = vmatpush3.bf16.msra.mxu1 %v2491_v57  ;;  %vm1969_vm0 = vcmask 254976   ;;  %v1698_v54 = vrot.slane %v1697_v51, 4  ;;  %v2493_v57 = vld [vmem:[%s3057_s15 + $0x8] sm:$0xff]  }
 0xb7f   : > { %2418 = vmatprep.subr.bf16.mxu1 %v2563_v1  ;;  %2425 = vmatpush3.bf16.msra.mxu0 %v2493_v57 }
 0xb80   : > { %v2414_v37 = vpop.f32.mrf.mxu0  ;;  %1634 = vadd.xlane.f32.xlu1 %v1633_v32  ;;  %v1699_v56 = vadd.f32 %v1698_v54, %v1697_v51  ;;  %2426 = vmatprep.subr.bf16.mxu0 %v2563_v1  ;;  %v624_v1 = vld [vmem:[%s3056_s14] sm:$0x1] }
 0xb82   : > { %v1962_v22 = vpop.f32.mrf.mxu0  ;;  %2419 = vmatpush3.bf16.msra.mxu1 %v2492_v0  ;;  %v2494_v0 = vld [vmem:[%s3057_s15] sm:$0xff]  }
 0xb83   : > { %2427 = vmatpush3.bf16.msra.mxu0 %v2494_v0 }
 0xb84   : > { %v2415_v28 = vpop.f32.mrf.mxu0 }
 0xc01   : > { %v1030_v63 = vpop.xlane.xlu1 %1029 }
 0xc02   : > { %v1031_v10 = vrot.slane %v1030_v63, 4 }
 0xc04   : > { %v1032_v5 = vadd.f32 %v1031_v10, %v1030_v63 }
 0xc05   : > { %v1606_v13 = vpop.xlane.xlu1 %1605 }
 0xc06   : > { %v1033_v6 = vrot.slane %v1032_v5, 2  ;;  %v1607_v14 = vrot.slane %v1606_v13, 4 }
 0xc08   : > { %v1034_v12 = vadd.f32 %v1033_v6, %v1032_v5  ;;  %v1608_v24 = vadd.f32 %v1607_v14, %v1606_v13 }
 0xc09   : > { %v1635_v16 = vpop.xlane.xlu1 %1634 }
 0xc0a   : > { %v1035_v9 = vrot.slane %v1034_v12, 1  ;;  %v1636_v19 = vrot.slane %v1635_v16, 4  ;;  %v1609_v59 = vrot.slane %v1608_v24, 2 }
 0xc0c   : > { %v1036_v7 = vadd.f32 %v1035_v9, %v1034_v12  ;;  %v1637_v26 = vadd.f32 %v1636_v19, %v1635_v16  ;;  %v1610_v36 = vadd.f32 %v1609_v59, %v1608_v24  ;;  %v1719_v19 = vmul.f32 0.31622776, %v2750_v58 }
 0xc0e   : > { %2447 = vpush %v1036_v7  ;;  %v1638_v38 = vrot.slane %v1637_v26, 2  ;;  %v1611_v53 = vrot.slane %v1610_v36, 1 }
 0xc10   : > { %v1639_v60 = vadd.f32 %v1638_v38, %v1637_v26  ;;  %v1612_v33 = vadd.f32 %v1611_v53, %v1610_v36  ;;  %v2094_v36 = vstv %s933_s26 }
 0xc12   : > { %v1640_v52 = vrot.slane %v1639_v60, 1 }
 0xc14   : > { %v1641_v11 = vadd.f32 %v1640_v52, %v1639_v60 }
 0xc3d   : > { %v1904_v17 = vpop.f32.mrf.mxu1 }
 0xc3e   : > { %v1905_v50 = vadd.f32 %v2226_v2, %v1904_v17 }
 0xc3f   : > { %v2406_v18 = vpop.f32.mrf.mxu1  ;;  %s2448_s30 = spop %2447 }
 0xc40   : > { %v1038_v20 = vstv %s2448_s30  ;;  %v1966_v21 = vadd.f32 %v1959_v61, %v1905_v50  ;;  %v1700_v61 = vrot.slane %v1699_v56, 2 }
 0xc41   : > { %v1907_v46 = vpop.f32.mrf.mxu1  ;;  %2545 = vrsqrt.f32 %v1038_v20  ;;  %vm1041_vm2 = vcmp.eq.f32.partialorder %v1038_v20, inf  ;;  %v1044_v42 = vand.u32 2147483648, %v1038_v20  ;;  %vm1043_vm9 = vcmp.eq.f32.partialorder %v1038_v20, 0.0 }
 0xc42   : > { %v1908_v23 = vadd.f32 %v2226_v2, %v1907_v46  ;;  %v1968_v30 = vsel %vm651_vm1, %v1966_v21, 0.0  ;;  %v1701_v32 = vadd.f32 %v1700_v61, %v1699_v56 }
 0xc43   : > { %v2407_v25 = vpop.f32.mrf.mxu1 }
 0xc44   : > { %v1967_v29 = vadd.f32 %v1962_v22, %v1908_v23  ;;  %v1702_v37 = vrot.slane %v1701_v32, 1 }
 0xc46   : > { %v1970_v31 = vsel %vm1969_vm0, %v1967_v29, 0.0  ;;  %v1703_v28 = vadd.f32 %v1702_v37, %v1701_v32 }
 0xc47   : > { %v1971_v34 = vadd.f32 %v1970_v31, %v1968_v30 }
 0xc49   : > { %v1972_v35 = vrot.slane %v1971_v34, 4 }
 0xc4b   : > { %v1973_v3 = vadd.f32 %v1972_v35, %v1971_v34 }
 0xc4d   : > { %v1974_v40 = vrot.slane %v1973_v3, 2 }
 0xc4e   : > { %v2546_v43 = vpop.eup %2545 }
 0xc4f   : > { %v1975_v41 = vadd.f32 %v1974_v40, %v1973_v3  ;;  %v1040_v27 = vmul.f32 %v2546_v43, %v1038_v20  ;;  %v629_v3 = vld [vmem:[%s3058_s16] sm:$0x1] }
 0xc51   : > { %v1976_v8 = vrot.slane %v1975_v41, 1  ;;  %v1042_v44 = vsel %vm1041_vm2, %v1038_v20, %v1040_v27  ;;  %v1720_v20 = vmul.f32 0.31622776, %v2759_v62 }
 0xc52   : > { %v1045_v47 = vsel %vm1043_vm9, %v1044_v42, %v1042_v44 }
 0xc53   : > { %v1977_v45 = vadd.f32 %v1976_v8, %v1975_v41  ;;  %2449 = vpush %v1045_v47 }
 0xc54   : > { %2451 = vpush %v1612_v33 }
 0xc55   : > { %v1979_v48 = vmul.f32 0.1, %v1977_v45  ;;  %2453 = vpush %v1641_v11 }
 0xc57   : > { %v1980_v49 = vpack.c.bf16 %v1979_v48, %v1979_v48 }
 0xc59   : > { %2421 = vmatmul.mubr.msk.bf16.vlgmr.msra.gmra.mxu1 %vm651_vm1, %v1980_v49 }
 0xc84   : > { %s3000_s0 = spop %2449 }
 0xc85   : > { %s3002_s19 = spop %2451  ;;  %v2098_v40 = vstv %s3000_s0 }
 0xc86   : > { %s2454_s1 = spop %2453 }
 0xc87   : > { %s1643_s20 = sadd.f32 1e-15, %s2454_s1 }
 0xc89   : > { %v1644_v39 = vstv %s1643_s20 }
 0xc8a   : > { %2547 = vrcp.f32 %v1644_v39 }
 0xc97   : > { %v2548_v22 = vpop.eup %2547 }
 0xc98   : > { %2455 = vpush %v2548_v22 }
 0xc99   : > { %2457 = vpush %v1703_v28 }
 0xcc9   : > { %s3011_s28 = spop %2455 }
 0xcca   : > { %s2458_s29 = spop %2457  ;;  %s1647_s27 = smul.f32 %s3011_s28, %s3002_s19 }
 0xccb   : > { %v1705_v63 = vstv %s2458_s29  ;;  %s575_s28 = scalar_lea.vmem %s3059_s17, %s3065_s25 }
 0xccc   : > { %2549 = vrsqrt.f32 %v1705_v63  ;;  %vm1708_vm12 = vcmp.eq.f32.partialorder %v1705_v63, inf  ;;  %v1711_v6 = vand.u32 2147483648, %v1705_v63  ;;  %vm1710_vm3 = vcmp.eq.f32.partialorder %v1705_v63, 0.0 }
 0xcd9   : > { %v2550_v10 = vpop.eup %2549 }
 0xcda   : > { %v1707_v5 = vmul.f32 %v2550_v10, %v1705_v63 }
 0xcdc   : > { %v1709_v12 = vsel %vm1708_vm12, %v1705_v63, %v1707_v5 }
 0xcdd   : > { %v1712_v9 = vsel %vm1710_vm3, %v1711_v6, %v1709_v12 }
 0xcde   : > { %2459 = vpush %v1712_v9 }
 0xd0f   : > { %s2460_s30 = spop %2459 }
 0xd10   : > { %s1714_s1 = sadd.f32 1e-15, %s2460_s30 }
 0xd12   : > { %v1715_v7 = vstv %s1714_s1  ;;  %s1648_s1 = ssub.f32 0.0, %s1647_s27 }
 0xd13   : > { %2551 = vrcp.f32 %v1715_v7 }
 0xd14   : > { %v2102_v27 = vstv %s1648_s1 }
 0xd19   : > { %v2030_v13 = vpop.f32.mrf.mxu1 }
 0xd1a   : > { %v2031_v2 = vadd.f32 %v2030_v13, %v624_v1 }
 0xd1b   : > { %v2422_v16 = vpop.f32.mrf.mxu1 }
 0xd1c   : > { %v2036_v17 = vmax.f32 %v2031_v2, 0.0 }
 0xd1d   : > { %v2033_v50 = vpop.f32.mrf.mxu1 }
 0xd1e   : > { %v2037_v14 = vpack.c.bf16 %v2036_v17, %v2036_v17 }
 0xd1f   : > { %v2423_v18 = vpop.f32.mrf.mxu1 }
 0xd20   : > { %2429 = vmatmul.mubr.msk.bf16.vlgmr.msra.gmra.mxu0 %vm651_vm1, %v2037_v14  ;;  %v2552_v46 = vpop.eup %2551  ;;  %vm2093_vm1 = vcmp.eq.s32.totalorder %v2743_v55, 12 }
 0xd21   : > { %v1717_v21 = vmul.f32 %v2552_v46, %v2890_v4  ;;  %v1718_v23 = vmul.f32 %v2552_v46, %v2894_v15  ;;  %v2095_v41 = vsel %vm2093_vm1, %v2094_v36, 0.0 }
 0xd23   : > { %v1721_v24 = vsub.f32 %v1717_v21, %v1719_v19  ;;  %v1722_v25 = vsub.f32 %v1718_v23, %v1720_v20 }
 0xd25   : > { %v1723_v26 = vmul.f32 %v1721_v24, %v1721_v24  ;;  %v1724_v29 = vmul.f32 %v1722_v25, %v1722_v25 }
 0xd27   : > { %v1725_v30 = vsel %vm1401_vm13, %v1723_v26, 0.0  ;;  %v1726_v31 = vsel %vm1693_vm5, %v1724_v29, 0.0  ;;  %vm2097_vm13 = vcmp.eq.s32.totalorder %v2743_v55, 13  ;;  %vm2101_vm5 = vcmp.eq.s32.totalorder %v2743_v55, 14 }
 0xd28   : > { %v1727_v58 = vadd.f32 %v1726_v31, %v1725_v30  ;;  %v2099_v8 = vsel %vm2097_vm13, %v2098_v40, 0.0  ;;  %v2103_v45 = vsel %vm2101_vm5, %v2102_v27, 0.0 }
 0xd2a   : > { %1728 = vadd.xlane.f32.xlu1 %v1727_v58 }
 0xdb3   : > { %v1729_v62 = vpop.xlane.xlu1 %1728 }
 0xdb4   : > { %v1730_v59 = vrot.slane %v1729_v62, 4 }
 0xdb6   : > { %v1731_v4 = vadd.f32 %v1730_v59, %v1729_v62 }
 0xdb8   : > { %v1732_v34 = vrot.slane %v1731_v4, 2 }
 0xdba   : > { %v1733_v15 = vadd.f32 %v1732_v34, %v1731_v4 }
 0xdbc   : > { %v1734_v38 = vrot.slane %v1733_v15, 1 }
 0xdbe   : > { %v1735_v35 = vadd.f32 %v1734_v38, %v1733_v15 }
 0xdc0   : > { %2461 = vpush %v1735_v35 }
 0xde0   : > { %v2087_v60 = vpop.f32.mrf.mxu0 }
 0xde1   : > { %v2088_v43 = vadd.f32 %v2087_v60, %v629_v3 }
 0xde2   : > { %v2430_v53 = vpop.f32.mrf.mxu0 }
 0xde3   : > { %v2096_v52 = vadd.f32 %v2095_v41, %v2088_v43 }
 0xde4   : > { %v2090_v42 = vpop.f32.mrf.mxu0 }
 0xde5   : > { %v2100_v44 = vadd.f32 %v2099_v8, %v2096_v52 }
 0xde6   : > { %v2431_v47 = vpop.f32.mrf.mxu0 }
 0xde7   : > { %v2104_v33 = vadd.f32 %v2103_v45, %v2100_v44 }
 0xdf1   : > { %s2462_s23 = spop %2461 }
 0xdf2   : > { %v1737_v11 = vstv %s2462_s23 }
 0xdf3   : > { %2553 = vrsqrt.f32 %v1737_v11  ;;  %vm1740_vm6 = vcmp.eq.f32.partialorder %v1737_v11, inf  ;;  %v1743_v51 = vand.u32 2147483648, %v1737_v11  ;;  %vm1742_vm7 = vcmp.eq.f32.partialorder %v1737_v11, 0.0 }
 0xe00   : > { %v2554_v48 = vpop.eup %2553 }
 0xe01   : > { %v1739_v49 = vmul.f32 %v2554_v48, %v1737_v11 }
 0xe03   : > { %v1741_v54 = vsel %vm1740_vm6, %v1737_v11, %v1739_v49 }
 0xe04   : > { %v1744_v56 = vsel %vm1742_vm7, %v1743_v51, %v1741_v54 }
 0xe05   : > { %2463 = vpush %v1744_v56 }
 0xe36   : > { %s2464_s18 = spop %2463 }
 0xe37   : > { %v2106_v39 = vstv %s2464_s18 }
 0xe38   : > { %v2107_v61 = vsel %vm2105_vm8, %v2106_v39, 0.0 }
 0xe39   : > { %v2108_v32 = vadd.f32 %v2107_v61, %v2104_v33 }
 0xe3b   : > { %2110 = vst.msk [vmem:[%s575_s28] sm:$0x1] %vm2109_vm10, %v2108_v32 }
 0xe3c PF: > { %s27_s24 = sadd.s32 1, %s2561_s24  }
 0xe3d   : > { %p24_p4 = scmp.ge.s32.totalorder %s27_s24, 4  }
 0xe3f   :  { %26 = sbr.rel (!%p24_p4) target bundleno = 3 (0x3), region = 124 }

</bundles_post_ra>
